<compile_context>
chip_gen: v5e
topology: v5e:2x2
jax: 0.10.0
libtpu: 0.0.40
codegen_flags: <defaults>
</compile_context>

<pallas_src>
import functools

import jax
import jax.numpy as jnp
from jax.experimental import pallas as pl
from jax.experimental.pallas import tpu as pltpu


def _round_up(x, m):
    return (x + m - 1) // m * m


def decoder_kernel(z_ref, w1_ref, b1_ref, w2_ref, b2_ref, w3_ref, b3_ref, o_ref):
    """Fused 3-layer MLP: sigmoid(fc3(relu(fc2(relu(fc1(z))))))."""
    # fc1 + relu: bf16 operands on the MXU, f32 accumulation / bias / relu.
    zb = z_ref[...].astype(jnp.bfloat16)
    h1 = jnp.dot(zb, w1_ref[...], preferred_element_type=jnp.float32)
    h1 = jnp.maximum(h1 + b1_ref[...], 0.0)

    # fc2 + relu
    h2 = jnp.dot(h1.astype(jnp.bfloat16), w2_ref[...],
                 preferred_element_type=jnp.float32)
    h2 = jnp.maximum(h2 + b2_ref[...], 0.0)

    # fc3 (N padded to 896 for the matmul) + sigmoid. Drop the padded output
    # lanes BEFORE the store so the HBM write is exactly out_dim (784) wide --
    # no padded writeback and no extra slice pass in the wrapper.
    logits = jnp.dot(h2.astype(jnp.bfloat16), w3_ref[...],
                     preferred_element_type=jnp.float32)
    logits = logits + b3_ref[...]
    logits = logits[:, : o_ref.shape[1]]

    # sigmoid = 1 / (1 + exp(-x)): exp and approx reciprocal both run on the
    # otherwise-idle EUP slot (no VALU Newton divide on 512x784 elements).
    o_ref[...] = pl.reciprocal(1.0 + jnp.exp(-logits), approx=True).astype(o_ref.dtype)


def prepare_params(params):
    """One-time (init-time) padding + bf16 cast of the decoder parameters.

    Hidden dim is zero-padded 200->256 and the fc3 output dim 784->896 so every
    matmul / bias / relu runs on lane-dense (multiple-of-128) shapes. Zero
    padding is exact through relu; padded output lanes are dropped inside the
    kernel before the store. Weights are cast to bf16 once here (full MXU rate,
    half the resident VMEM); biases stay f32 for the f32 epilogues.
    """
    w1, b1, w2, b2, w3, b3 = params
    in_dim, hid = w1.shape
    out_dim = w3.shape[1]
    hid_p = _round_up(hid, 128)
    out_p = _round_up(out_dim, 128)

    w1p = jnp.zeros((in_dim, hid_p), jnp.bfloat16).at[:, :hid].set(w1.astype(jnp.bfloat16))
    b1p = jnp.zeros((1, hid_p), jnp.float32).at[:, :hid].set(b1.reshape(1, -1))
    w2p = jnp.zeros((hid_p, hid_p), jnp.bfloat16).at[:hid, :hid].set(w2.astype(jnp.bfloat16))
    b2p = jnp.zeros((1, hid_p), jnp.float32).at[:, :hid].set(b2.reshape(1, -1))
    w3p = jnp.zeros((hid_p, out_p), jnp.bfloat16).at[:hid, :out_dim].set(w3.astype(jnp.bfloat16))
    b3p = jnp.zeros((1, out_p), jnp.float32).at[:, :out_dim].set(b3.reshape(1, -1))
    return (w1p, b1p, w2p, b2p, w3p, b3p), out_dim


@functools.partial(jax.jit, static_argnames=("out_dim", "tile_b"))
def decoder_forward(z, padded_params, *, out_dim, tile_b=512):
    """Fused decoder forward. z: (B, input_dim) f32 -> (B, out_dim) f32."""
    w1p, b1p, w2p, b2p, w3p, b3p = padded_params
    B, in_dim = z.shape
    hid_p = w1p.shape[1]
    out_p = w3p.shape[1]

    # Large tiles amortize the ~0.35us/grid-step overhead; the cdiv(B,2) clamp
    # keeps >=2 grid steps whenever possible so both TensorCores get work on
    # v7x (grid axis is "parallel").
    tb = min(tile_b, max(8, _round_up(-(-B // 2), 8)))
    B_pad = _round_up(B, tb)
    if B_pad != B:
        z = jnp.zeros((B_pad, in_dim), z.dtype).at[:B].set(z)

    grid = (B_pad // tb,)
    # Constant index_map -> weights/biases are DMA'd once and stay VMEM-resident.
    resident = lambda shape: pl.BlockSpec(shape, lambda i: (0, 0))
    # TODO(synk): pipeline_mode=pl.Buffered(1) on the resident specs would save
    # ~0.6 MiB of unused second buffers; omitted for maximum lowering safety.

    out = pl.pallas_call(
        decoder_kernel,
        out_shape=jax.ShapeDtypeStruct((B_pad, out_dim), jnp.float32),
        grid_spec=pltpu.PrefetchScalarGridSpec(
            num_scalar_prefetch=0,
            grid=grid,
            in_specs=[
                pl.BlockSpec((tb, in_dim), lambda i: (i, 0)),  # z tile (f32)
                resident((in_dim, hid_p)),   # w1 (bf16)
                resident((1, hid_p)),        # b1 (f32)
                resident((hid_p, hid_p)),    # w2 (bf16)
                resident((1, hid_p)),        # b2 (f32)
                resident((hid_p, out_p)),    # w3 (bf16, N padded to 896)
                resident((1, out_p)),        # b3 (f32)
            ],
            out_specs=pl.BlockSpec((tb, out_dim), lambda i: (i, 0)),
        ),
        compiler_params=pltpu.CompilerParams(
            dimension_semantics=("parallel",),
            # Explicit limit: v5e's default scoped VMEM (16 MiB) is too small
            # for tb=512 double-buffered output tiles + activation temporaries.
            vmem_limit_bytes=48 * 1024 * 1024,
        ),
    )(z, w1p, b1p, w2p, b2p, w3p, b3p)

    return out[:B] if B_pad != B else out


def init_params(key, input_dim=20, hidden_dim=200, output_dim=784):
    """Deterministic synthetic parameters (torch.nn.Linear-equivalent, stored
    transposed as (in_features, out_features) so the kernel does z @ W + b)."""
    ks = jax.random.split(key, 6)
    s1 = 1.0 / jnp.sqrt(input_dim)
    s2 = 1.0 / jnp.sqrt(hidden_dim)
    w1 = jax.random.uniform(ks[0], (input_dim, hidden_dim), jnp.float32, -s1, s1)
    b1 = jax.random.uniform(ks[1], (1, hidden_dim), jnp.float32, -s1, s1)
    w2 = jax.random.uniform(ks[2], (hidden_dim, hidden_dim), jnp.float32, -s2, s2)
    b2 = jax.random.uniform(ks[3], (1, hidden_dim), jnp.float32, -s2, s2)
    w3 = jax.random.uniform(ks[4], (hidden_dim, output_dim), jnp.float32, -s2, s2)
    b3 = jax.random.uniform(ks[5], (1, output_dim), jnp.float32, -s2, s2)
    return (w1, b1, w2, b2, w3, b3)


def decoder_ref(z, params):
    """Pure-JAX f32 reference matching the PyTorch module."""
    w1, b1, w2, b2, w3, b3 = params
    h1 = jnp.maximum(z @ w1 + b1, 0.0)
    h2 = jnp.maximum(h1 @ w2 + b2, 0.0)
    return jax.nn.sigmoid(h2 @ w3 + b3)


if __name__ == "__main__":
    key = jax.random.PRNGKey(0)
    k_params, k_z1, k_z2 = jax.random.split(key, 3)

    input_dim, hidden_dim, output_dim = 20, 200, 784
    params = init_params(k_params, input_dim, hidden_dim, output_dim)
    padded_params, out_dim = prepare_params(params)   # one-time pad + bf16 cast

    # Case 1: B=16 -> two batch tiles (exercises the multi-step parallel grid).
    z16 = jax.random.normal(k_z1, (16, input_dim), jnp.float32)
    out16 = jax.block_until_ready(decoder_forward(z16, padded_params, out_dim=out_dim))
    ref16 = decoder_ref(z16, params)
    assert out16.shape == (16, output_dim)
    # bf16 matmuls + approx reciprocal -> loosened (but still meaningful) tolerance.
    assert jnp.allclose(out16, ref16, atol=1e-2, rtol=1e-2), "mismatch (B=16)"

    # Case 2: B=12 exercises the batch-padding + row-slice path.
    z12 = jax.random.normal(k_z2, (12, input_dim), jnp.float32)
    out12 = jax.block_until_ready(decoder_forward(z12, padded_params, out_dim=out_dim))
    ref12 = decoder_ref(z12, params)
    assert out12.shape == (12, output_dim)
    assert jnp.allclose(out12, ref12, atol=1e-2, rtol=1e-2), "mismatch (B=12)"

    print("KERNEL_OK")
</pallas_src>

<mosaic_0001>
module attributes {stable_mosaic.version = 11 : i64} {
  func.func @decoder_kernel(%arg0: i32, %arg1: memref<8x20xf32, #tpu.memory_space<vmem>>, %arg2: memref<20x256xbf16, #tpu.memory_space<vmem>>, %arg3: memref<1x256xf32, #tpu.memory_space<vmem>>, %arg4: memref<256x256xbf16, #tpu.memory_space<vmem>>, %arg5: memref<1x256xf32, #tpu.memory_space<vmem>>, %arg6: memref<256x896xbf16, #tpu.memory_space<vmem>>, %arg7: memref<1x896xf32, #tpu.memory_space<vmem>>, %arg8: memref<8x784xf32, #tpu.memory_space<vmem>>) attributes {dimension_semantics = [#tpu.dimension_semantics<parallel>], iteration_bounds = array<i64: 2>, scalar_prefetch = 0 : i64, scratch_operands = 0 : i64, tpu.core_type = #tpu.core_type<tc>, window_params = [{transform_indices = @transform_0, window_bounds = array<i64: 8, 20>}, {pipeline_mode = #tpu.pipeline_mode<synchronous>, transform_indices = @transform_1, window_bounds = array<i64: 20, 256>}, {pipeline_mode = #tpu.pipeline_mode<synchronous>, transform_indices = @transform_2, window_bounds = array<i64: 1, 256>}, {pipeline_mode = #tpu.pipeline_mode<synchronous>, transform_indices = @transform_3, window_bounds = array<i64: 256, 256>}, {pipeline_mode = #tpu.pipeline_mode<synchronous>, transform_indices = @transform_4, window_bounds = array<i64: 1, 256>}, {pipeline_mode = #tpu.pipeline_mode<synchronous>, transform_indices = @transform_5, window_bounds = array<i64: 256, 896>}, {pipeline_mode = #tpu.pipeline_mode<synchronous>, transform_indices = @transform_6, window_bounds = array<i64: 1, 896>}, {transform_indices = @transform_7, window_bounds = array<i64: 8, 784>}]} {
    %c0 = arith.constant 0 : index
    %c0_0 = arith.constant 0 : index
    %0 = vector.load %arg1[%c0, %c0_0] : memref<8x20xf32, #tpu.memory_space<vmem>>, vector<8x20xf32>
    %1 = arith.truncf %0 : vector<8x20xf32> to vector<8x20xbf16>
    %c0_1 = arith.constant 0 : index
    %c0_2 = arith.constant 0 : index
    %2 = vector.load %arg2[%c0_1, %c0_2] : memref<20x256xbf16, #tpu.memory_space<vmem>>, vector<20x256xbf16>
    %cst = arith.constant dense<0.000000e+00> : vector<8x256xf32>
    %3 = tpu.matmul %1, %2, %cst {dimension_numbers = #tpu.dot_dimension_numbers<[1], [0], [0], [1], [0, 0, 1, 1], [], []>} : vector<8x20xbf16>, vector<20x256xbf16>, vector<8x256xf32> -> vector<8x256xf32>
    %c0_3 = arith.constant 0 : index
    %c0_4 = arith.constant 0 : index
    %4 = vector.load %arg3[%c0_3, %c0_4] : memref<1x256xf32, #tpu.memory_space<vmem>>, vector<1x256xf32>
    %5 = vector.broadcast %4 : vector<1x256xf32> to vector<8x256xf32>
    %6 = arith.addf %3, %5 : vector<8x256xf32>
    %cst_5 = arith.constant 0.000000e+00 : f32
    %7 = vector.broadcast %cst_5 : f32 to vector<8x256xf32>
    %8 = arith.maximumf %6, %7 : vector<8x256xf32>
    %9 = arith.truncf %8 : vector<8x256xf32> to vector<8x256xbf16>
    %c0_6 = arith.constant 0 : index
    %c0_7 = arith.constant 0 : index
    %10 = vector.load %arg4[%c0_6, %c0_7] : memref<256x256xbf16, #tpu.memory_space<vmem>>, vector<256x256xbf16>
    %cst_8 = arith.constant dense<0.000000e+00> : vector<8x256xf32>
    %11 = tpu.matmul %9, %10, %cst_8 {dimension_numbers = #tpu.dot_dimension_numbers<[1], [0], [0], [1], [0, 0, 1, 1], [], []>} : vector<8x256xbf16>, vector<256x256xbf16>, vector<8x256xf32> -> vector<8x256xf32>
    %c0_9 = arith.constant 0 : index
    %c0_10 = arith.constant 0 : index
    %12 = vector.load %arg5[%c0_9, %c0_10] : memref<1x256xf32, #tpu.memory_space<vmem>>, vector<1x256xf32>
    %13 = vector.broadcast %12 : vector<1x256xf32> to vector<8x256xf32>
    %14 = arith.addf %11, %13 : vector<8x256xf32>
    %cst_11 = arith.constant 0.000000e+00 : f32
    %15 = vector.broadcast %cst_11 : f32 to vector<8x256xf32>
    %16 = arith.maximumf %14, %15 : vector<8x256xf32>
    %17 = arith.truncf %16 : vector<8x256xf32> to vector<8x256xbf16>
    %c0_12 = arith.constant 0 : index
    %c0_13 = arith.constant 0 : index
    %18 = vector.load %arg6[%c0_12, %c0_13] : memref<256x896xbf16, #tpu.memory_space<vmem>>, vector<256x896xbf16>
    %cst_14 = arith.constant dense<0.000000e+00> : vector<8x896xf32>
    %19 = tpu.matmul %17, %18, %cst_14 {dimension_numbers = #tpu.dot_dimension_numbers<[1], [0], [0], [1], [0, 0, 1, 1], [], []>} : vector<8x256xbf16>, vector<256x896xbf16>, vector<8x896xf32> -> vector<8x896xf32>
    %c0_15 = arith.constant 0 : index
    %c0_16 = arith.constant 0 : index
    %20 = vector.load %arg7[%c0_15, %c0_16] : memref<1x896xf32, #tpu.memory_space<vmem>>, vector<1x896xf32>
    %21 = vector.broadcast %20 : vector<1x896xf32> to vector<8x896xf32>
    %22 = arith.addf %19, %21 : vector<8x896xf32>
    %23 = vector.extract_strided_slice %22 {offsets = [0, 0], sizes = [8, 784], strides = [1, 1]} : vector<8x896xf32> to vector<8x784xf32>
    %cst_17 = arith.constant 0.000000e+00 : f32
    %24 = vector.broadcast %cst_17 : f32 to vector<8x784xf32>
    %25 = arith.subf %24, %23 : vector<8x784xf32>
    %26 = math.exp %25 : vector<8x784xf32>
    %cst_18 = arith.constant 1.000000e+00 : f32
    %27 = vector.broadcast %cst_18 : f32 to vector<8x784xf32>
    %28 = arith.addf %27, %26 : vector<8x784xf32>
    %29 = tpu.reciprocal %28 {approx = true} : vector<8x784xf32> -> vector<8x784xf32>
    %c0_19 = arith.constant 0 : index
    %c0_20 = arith.constant 0 : index
    %30 = vector.load %arg8[%c0_19, %c0_20] : memref<8x784xf32, #tpu.memory_space<vmem>>, vector<8x784xf32>
    tpu.vector_store %arg8[%c0_19, %c0_20], %29 {strides = array<i32>} : memref<8x784xf32, #tpu.memory_space<vmem>>, vector<8x784xf32>,
    return
  }
  func.func @transform_0(%arg0: i32) -> (i32, i32) {
    %c0_i32 = arith.constant 0 : i32
    %c0_i32_0 = arith.constant 0 : i32
    return %arg0, %c0_i32 : i32, i32
  }
  func.func @transform_1(%arg0: i32) -> (i32, i32) {
    %c0_i32 = arith.constant 0 : i32
    %c0_i32_0 = arith.constant 0 : i32
    %c0_i32_1 = arith.constant 0 : i32
    return %c0_i32, %c0_i32_0 : i32, i32
  }
  func.func @transform_2(%arg0: i32) -> (i32, i32) {
    %c0_i32 = arith.constant 0 : i32
    %c0_i32_0 = arith.constant 0 : i32
    %c0_i32_1 = arith.constant 0 : i32
    return %c0_i32, %c0_i32_0 : i32, i32
  }
  func.func @transform_3(%arg0: i32) -> (i32, i32) {
    %c0_i32 = arith.constant 0 : i32
    %c0_i32_0 = arith.constant 0 : i32
    %c0_i32_1 = arith.constant 0 : i32
    return %c0_i32, %c0_i32_0 : i32, i32
  }
  func.func @transform_4(%arg0: i32) -> (i32, i32) {
    %c0_i32 = arith.constant 0 : i32
    %c0_i32_0 = arith.constant 0 : i32
    %c0_i32_1 = arith.constant 0 : i32
    return %c0_i32, %c0_i32_0 : i32, i32
  }
  func.func @transform_5(%arg0: i32) -> (i32, i32) {
    %c0_i32 = arith.constant 0 : i32
    %c0_i32_0 = arith.constant 0 : i32
    %c0_i32_1 = arith.constant 0 : i32
    return %c0_i32, %c0_i32_0 : i32, i32
  }
  func.func @transform_6(%arg0: i32) -> (i32, i32) {
    %c0_i32 = arith.constant 0 : i32
    %c0_i32_0 = arith.constant 0 : i32
    %c0_i32_1 = arith.constant 0 : i32
    return %c0_i32, %c0_i32_0 : i32, i32
  }
  func.func @transform_7(%arg0: i32) -> (i32, i32) {
    %c0_i32 = arith.constant 0 : i32
    %c0_i32_0 = arith.constant 0 : i32
    return %arg0, %c0_i32 : i32, i32
  }
}

</mosaic_0001>

<bundles_post_ra>
// kernel: decoder_forward.1
= control target key start
LH: loop header
LB: loop body
LE: loop exit
PB: predicated region body
PF: predicated region fallthrough
CT: control target
= control target key end

     0   :  { %s3185_s0 = inlined_call_operand.hbm [shape: f32[16,20], index: 0, kind: input, shape index: {}]   ;;  %s3186_s1 = inlined_call_operand.hbm [shape: bf16[20,256], index: 1, kind: input, shape index: {}]   ;;  %s3187_s2 = inlined_call_operand.hbm [shape: f32[1,256], index: 2, kind: input, shape index: {}]   ;;  %s3188_s3 = inlined_call_operand.hbm [shape: bf16[256,256], index: 3, kind: input, shape index: {}]   ;;  %s3189_s4 = inlined_call_operand.vmem [shape: f32[1,256], index: 4, kind: input, shape index: {}]   ;;  %s3190_s5 = inlined_call_operand.hbm [shape: bf16[256,896], index: 5, kind: input, shape index: {}]   ;;  %s3191_s6 = inlined_call_operand.hbm [shape: f32[1,896], index: 6, kind: input, shape index: {}]   ;;  %s3192_s7 = inlined_call_operand.hbm [shape: f32[16,784], index: 7, kind: output, shape index: {}]  }
   0x1   :  { %3193 = sst [smem:[#allocation19_spill]] %s3186_s1 }
   0x2   :  { %12 = vsyncpa [#allocation3], 0 }
   0x3   :  { %14 = vsyncpa [#allocation3 + $0x1], 0 }
   0x4   :  { %15 = vsyncpa [#allocation6], 0 }
   0x5   :  { %16 = vsyncpa [#allocation9], 0 }
   0x6   :  { %17 = vsyncpa [#allocation12], 0 }
   0x7   :  { %18 = vsyncpa [#allocation4], 0 }
   0x8   :  { %20 = vsyncpa [#allocation4 + $0x1], 0  ;;  %s2969_s24 = smov 0   ;;  %s2971_s25 = smov 0  }
   0x9   :  { %s2973_s26 = smov 0   ;;  %s2975_s27 = smov 0  }
   0xa LB: > { %s3194_s1 = sld [smem:[#allocation19_spill]]  ;;  %s2993_s8 = sadd.s32 4294967295, %s2918_s27   ;;  %s2918_s27 = sphi %s2975_s27, %s3205_s27   ;;  %s2914_s26 = sphi %s2973_s26, %s3204_s26   ;;  %s2910_s25 = sphi %s2971_s25, %s3203_s25   ;;  %s2906_s24 = sphi %s2969_s24, %s3202_s24  }
   0xb   : > { %p1778_p0 = scmp.ge.s32.totalorder %s2918_s27, 1  ;;  %p47_p1 = scmp.eq.s32.totalorder %s2993_s8, 0 }
   0xc   : > { %p209_p2 = scmp.lt.s32.totalorder %s2918_s27, 3  ;;  %s2920_s10 = smov [#allocation5]  }
   0xd   : > { %s222_s11 = sshll.u32 %s2920_s10, 4  ;;  %s246_s14 = sshll.u32 %s3188_s3, 4  ;;  %s223_s11 = int_to_ptr.vmem [resolvable:$true] %s222_s11  ;;  %s247_s14 = int_to_ptr.hbm [resolvable:$true] %s246_s14 }
   0xe   : > { %p2998_p3 = pnand %p1778_p0, %p209_p2  ;;  %s235_s18 = sshll.u32 %s3187_s2, 4  ;;  %s236_s18 = int_to_ptr.hbm [resolvable:$true] %s235_s18 }
   0xf   : > { %s2921_s19 = smov [#allocation8]   ;;  %s2922_s21 = smov 128  }
  0x10   : > { %s220_s30 = sshll.u32 %s3194_s1, 4  ;;  %p2555_p4 = pneg %p2998_p3  ;;  %s221_s30 = int_to_ptr.hbm [resolvable:$true] %s220_s30 }
  0x11   : > { %s248_s20 = sshll.u32 %s2921_s19, 4  ;;  %s2923_s22 = smov 8   ;;  %s249_s20 = int_to_ptr.vmem [resolvable:$true] %s248_s20 }
  0x12   : > { %p3010_p6 = pnand %p2555_p4, %p47_p1  ;;  %s263_s29 = sshll.u32 %s3190_s5, 4  ;;  %s264_s29 = int_to_ptr.hbm [resolvable:$true] %s263_s29 }
  0x13   : > { %s2924_s10 = smov [#allocation7]   ;;  %s2926_s13 = smov 448  }
  0x14   : > { %2558 = dma.hbm_to_vmem [thread:$0]  (!%p3010_p6), %s221_s30, 384, %s223_s11, [#allocation6], %s2922_s21, %s2922_s21, %s2923_s22  }
  0x15   : > { %2564 = dma.hbm_to_vmem [thread:$0]  (!%p3010_p6), %s247_s14, 4096, %s249_s20, [#allocation9], %s2922_s21, %s2922_s21, %s2923_s22  }
  0x16   : > { %s237_s12 = sshll.u32 %s2924_s10, 4  ;;  %s2925_s30 = smov [#allocation10]   ;;  %s238_s12 = int_to_ptr.vmem [resolvable:$true] %s237_s12 }
  0x17   : > { %2561 = dma.hbm_to_vmem [thread:$0]  (!%p3010_p6), %s236_s18, 32, %s238_s12, [#allocation6]  }
  0x18   : > { %s265_s11 = sshll.u32 %s2925_s30, 4  ;;  %s2927_s14 = smov 28   ;;  %s266_s11 = int_to_ptr.vmem [resolvable:$true] %s265_s11 }
  0x19   : > { %2567 = dma.hbm_to_vmem [thread:$0]  (!%p3010_p6), %s264_s29, 14336, %s266_s11, [#allocation9], %s2926_s13, %s2926_s13, %s2927_s14  }
  0x1a   : > { %s278_s19 = sshll.u32 %s3191_s6, 4  ;;  %s2928_s18 = smov [#allocation11]   ;;  %s279_s19 = int_to_ptr.hbm [resolvable:$true] %s278_s19 }
  0x1b   : > { %s280_s20 = sshll.u32 %s2928_s18, 4  ;;  %s1777_s21 = sadd.s32 4294967294, %s2918_s27   ;;  %s281_s20 = int_to_ptr.vmem [resolvable:$true] %s280_s20 }
  0x1c   : > { %2570 = dma.hbm_to_vmem [thread:$0]  (!%p3010_p6), %s279_s19, 112, %s281_s20, [#allocation12]  }
  0x1d   : > { %s3035_s22 = sadd.s32 1, %s2918_s27   ;;  %s33_s23 = sadd.s32 1, %s2914_s26 }
  0x1e   : > { %s30_s28 = ssub.s32 %s2918_s27, %s3035_s22  ;;  %p40_p7 = scmp.ne.s32.totalorder %s2914_s26, %s2910_s25 }
  0x1f   : > { %p31_p8 = scmp.eq.s32.totalorder %s30_s28, 0  ;;  %p41_p9 = scmp.eq.s32.totalorder %s2918_s27, 0 }
  0x20   : > { %p46_p10 = scmp.ne.s32.totalorder %s2910_s25, %s2906_s24  ;;  %p196_p11 = scmp.eq.s32.totalorder %s2993_s8, 1 }
  0x21   : > { %s3047_s29 = scalar_select %p31_p8, %s2914_s26, %s33_s23  }
  0x22   : > { %p3051_p12 = por %p47_p1, %p46_p10  ;;  %p3055_p13 = por %p196_p11, %p40_p7 }
  0x23   : > { %p202_p0 = scmp.eq.s32.totalorder %s1777_s21, 1  ;;  %p42_p2 = por %p41_p9, %p40_p7 }
  0x24   : > { %s291_s12 = sand.u32 1, %s2914_s26   ;;  %p2584_p6 = scmp.lt.s32.totalorder %s2918_s27, 2 }
  0x25   : > { %p3060_p4 = por %p202_p0, %p46_p10  ;;  %s1785_s11 = sshll.u32 %s291_s12, 3 }
  0x26   : > { %s1786_s13 = sshll.u32 %s2918_s27, 3  ;;  %s295_s18 = scalar_lea.vmem [#allocation2], %s1785_s11 }
  0x27   : > { %s299_s17 = scalar_lea.hbm %s3185_s0, %s1786_s13  ;;  %s303_s20 = sshll.u32 %s295_s18, 4  ;;  %s304_s20 = int_to_ptr.vmem [resolvable:$true] %s303_s20 }
  0x28   : > { %s301_s19 = sshll.u32 %s299_s17, 4  ;;  %p3069_p8 = pnand %p2584_p6, %p42_p2  ;;  %s302_s19 = int_to_ptr.hbm [resolvable:$true] %s301_s19 }
  0x29   : > { %s292_s23 = scalar_lea.sflag [#allocation3], %s291_s12  ;;  %s2810_s28 = sshra.s32 %s302_s19, 4  ;;  %s2811_s28 = int_to_ptr.hbm [resolvable:$true] %s2810_s28 }
  0x2a   : > { %s2812_s1 = scalar_lea.hbm %s2811_s28, 8  ;;  %p2814_p9 = pneg %p3069_p8 }
  0x2b   : > { %p2813_p7 = scmp.ne.s32.totalorder %s2811_s28, %s2812_s1  ;;  %s2817_s11 = scalar_lea.hbm %s3185_s0, 16 }
  0x2c   : > { %p2818_p0 = scmp.lt.s32.totalorder %s2811_s28, %s3185_s0  ;;  %p2819_p2 = scmp.lt.s32.totalorder %s2817_s11, %s2812_s1 }
  0x2d   : > { %p2815_p10 = pnand %p2814_p9, %p2813_p7 }
  0x2e   : > { %p2820_p6 = por %p2819_p2, %p2818_p0 }
  0x2f   : > { %p2816_p11 = pneg %p2815_p10 }
  0x31   : > { %p2821_p5 = pnand %p2820_p6, %p2816_p11 }
  0x33   : > { %2824 = shalt.err (!%p2821_p5)
}
  0x34   : > { %2574 = dma.hbm_to_vmem [thread:$0]  (!%p3069_p8), %s302_s19, 128, %s304_s20, %s292_s23  }
  0x35   : > { %312 = sbr.rel (%p2998_p3) target bundleno = 573 (0x23d), region = 48  ;;  %s3086_s12 = sand.u32 (!%p2998_p3), 1, %s2910_s25  }
  0x36   : > { %s1788_s18 = sshll.u32 (!%p2998_p3), %s3086_s12, 3  ;;  %s315_s13 = scalar_lea.sflag (!%p2998_p3), [#allocation3], %s3086_s12 }
  0x37   : > { %s3090_s14 = scalar_lea.vmem (!%p2998_p3), [#allocation2], %s1788_s18 }
  0x3a   : > { %2885 = dma.done.wait (%p3051_p12), %s315_s13, 128  }
  0x3b   : > { %2887 = vsyncadd (%p3051_p12), %s315_s13, 4294967168 }
  0x3c   : > { %2889 = dma.done.wait (%p47_p1), [#allocation6], 416  }
  0x3d   : > { %2891 = vsyncadd (%p47_p1), [#allocation6], 4294966880 }
  0x3e   : > { %2893 = dma.done.wait (%p47_p1), [#allocation9], 18432  }
  0x3f   : > { %2895 = vsyncadd (%p47_p1), [#allocation9], 4294948864 }
  0x40   : > { %2897 = dma.done.wait (%p47_p1), [#allocation12], 112  }
  0x41   : > { %2899 = vsyncadd (%p47_p1), [#allocation12], 4294967184  ;;  %v380_v0 = vld [vmem:[#allocation5 + $0x10] sm:$0x33]  ;;  %vm406_vm0 = vcmask 1041408   ;;  %vm402_vm1 = vcmask 162816  }
  0x42   : > { %v394_v1 = vunpack.c.l.b16 %v380_v0  ;;  %v395_v2 = vunpack.c.h.b16 %v380_v0  ;;  %v1796_v3 = vld [vmem:[#allocation5] sm:$0xf]  ;;  %v2384_v4 = vld [vmem:[#allocation5 + $0x4] sm:$0xf0]  ;;  %v2383_v5 = vld [vmem:[#allocation5 + $0x4] sm:$0xf] }
  0x43   : > { %v1798_v6 = vld [vmem:[#allocation5 + $0x8] sm:$0xf0]  ;;  %v2400_v8 = vld [vmem:[#allocation8 + $0x74] sm:$0xf0]  ;;  %v1864_v15 = vld [vmem:[#allocation8 + $0x78] sm:$0xf0]  ;;  %v1797_v24 = vor.u32 %v2384_v4, %v1796_v3 }
  0x44   : > { %v1862_v7 = vld [vmem:[#allocation8 + $0x70] sm:$0xf]  ;;  %v398_v10 = vpack.c.b16 %v394_v1, %v394_v1  ;;  %v399_v11 = vpack.c.b16 %v395_v2, %v395_v2  ;;  %v2416_v13 = vld [vmem:[#allocation8 + $0xf4] sm:$0xf0]  ;;  %v2399_v14 = vld [vmem:[#allocation8 + $0x74] sm:$0xf]  ;;  %v1801_v25 = vor.u32 %v2383_v5, %v1798_v6 }
  0x45   : > { %v1926_v9 = vld [vmem:[#allocation8 + $0xf0] sm:$0xf]  ;;  %v1863_v12 = vor.u32 %v2400_v8, %v1862_v7  ;;  %v2415_v17 = vld [vmem:[#allocation8 + $0xf4] sm:$0xf]  ;;  %v1928_v18 = vld [vmem:[#allocation8 + $0xf8] sm:$0xf0]  ;;  %v1867_v29 = vor.u32 %v2399_v14, %v1864_v15 }
  0x46   : > { %v1927_v16 = vor.u32 %v2416_v13, %v1926_v9  ;;  %v1854_v19 = vld [vmem:[#allocation8 + $0x60] sm:$0xf]  ;;  %v408_v20 = vsel %vm406_vm0, %v398_v10, 0  ;;  %v411_v21 = vsel %vm406_vm0, %v399_v11, 0  ;;  %v2398_v22 = vld [vmem:[#allocation8 + $0x64] sm:$0xf0]  ;;  %v1931_v30 = vor.u32 %v2415_v17, %v1928_v18 }
  0x47   : > { %641 = vmatpush.bf16.msra.mxu2 %v1863_v12  ;;  %v1918_v23 = vld [vmem:[#allocation8 + $0xe0] sm:$0xf]  ;;  %419 = vmatpush.bf16.msra.mxu0 %v408_v20  ;;  %v1855_v27 = vor.u32 %v2398_v22, %v1854_v19  ;;  %v2414_v28 = vld [vmem:[#allocation8 + $0xe4] sm:$0xf0]  ;;  %v2397_v31 = vld [vmem:[#allocation8 + $0x64] sm:$0xf] }
  0x48   : > { %432 = vmatpush.bf16.msra.mxu1 %v411_v21  ;;  %v376_v26 = vld [vmem:[%s3090_s14] sm:$0xff]  ;;  %654 = vmatpush.bf16.msra.mxu3 %v1927_v16  ;;  %v1856_v32 = vld [vmem:[#allocation8 + $0x68] sm:$0xf0]  ;;  %v1846_v33 = vld [vmem:[#allocation8 + $0x50] sm:$0xf]  ;;  %v1919_v34 = vor.u32 %v2414_v28, %v1918_v23  ;;  %s2529_s15 = smul.u32 56, %s3086_s12 }
  0x49   : > { %v2413_v35 = vld [vmem:[#allocation8 + $0xe4] sm:$0xf]  ;;  %v1920_v36 = vld [vmem:[#allocation8 + $0xe8] sm:$0xf0]  ;;  %v2396_v37 = vld [vmem:[#allocation8 + $0x54] sm:$0xf0]  ;;  %v377_v38 = vpack.c.bf16 %v376_v26, %v376_v26  ;;  %v1859_v42 = vor.u32 %v2397_v31, %v1856_v32 }
  0x4a   : > { %v1910_v39 = vld [vmem:[#allocation8 + $0xd0] sm:$0xf]  ;;  %v2412_v40 = vld [vmem:[#allocation8 + $0xd4] sm:$0xf0]  ;;  %v1847_v41 = vor.u32 %v2396_v37, %v1846_v33  ;;  %v1923_v43 = vor.u32 %v2413_v35, %v1920_v36  ;;  %v2395_v44 = vld [vmem:[#allocation8 + $0x54] sm:$0xf] }
  0x4b   : > { %642 = vmatpush.bf16.msra.mxu2 %v1855_v27  ;;  %420 = vmatpush.bf16.msra.mxu0 %v1797_v24  ;;  %v1838_v45 = vld [vmem:[#allocation8 + $0x40] sm:$0xf]  ;;  %v2394_v46 = vld [vmem:[#allocation8 + $0x44] sm:$0xf0]  ;;  %v1911_v47 = vor.u32 %v2412_v40, %v1910_v39  ;;  %v1848_v48 = vld [vmem:[#allocation8 + $0x58] sm:$0xf0] }
  0x4c   : > { %433 = vmatpush.bf16.msra.mxu1 %v1801_v25  ;;  %655 = vmatpush.bf16.msra.mxu3 %v1919_v34  ;;  %v2411_v49 = vld [vmem:[#allocation8 + $0xd4] sm:$0xf]  ;;  %v1912_v50 = vld [vmem:[#allocation8 + $0xd8] sm:$0xf0]  ;;  %v1902_v51 = vld [vmem:[#allocation8 + $0xc0] sm:$0xf]  ;;  %v1839_v53 = vor.u32 %v2394_v46, %v1838_v45  ;;  %v1851_v54 = vor.u32 %v2395_v44, %v1848_v48 }
  0x4d   : > { %v2410_v52 = vld [vmem:[#allocation8 + $0xc4] sm:$0xf0]  ;;  %v1915_v55 = vor.u32 %v2411_v49, %v1912_v50  ;;  %v2393_v56 = vld [vmem:[#allocation8 + $0x44] sm:$0xf]  ;;  %v1830_v57 = vld [vmem:[#allocation8 + $0x30] sm:$0xf] }
  0x4e   : > { %1802 = vmatmul.msk.bf16.vlgmr.msra.gmra.mxu0 %vm402_vm1, %v377_v38  ;;  %v2392_v58 = vld [vmem:[#allocation8 + $0x34] sm:$0xf0]  ;;  %v1903_v59 = vor.u32 %v2410_v52, %v1902_v51  ;;  %v1840_v60 = vld [vmem:[#allocation8 + $0x48] sm:$0xf0]  ;;  %v2409_v61 = vld [vmem:[#allocation8 + $0xc4] sm:$0xf] }
  0x4f   : > { %667 = vmatpush.bf16.msrb.mxu0 %v1867_v29  ;;  %1803 = vmatmul.msk.bf16.vlgmr.msra.gmra.mxu1 %vm402_vm1, %v377_v38  ;;  %v1904_v62 = vld [vmem:[#allocation8 + $0xc8] sm:$0xf0]  ;;  %v1894_v63 = vld [vmem:[#allocation8 + $0xb0] sm:$0xf]  ;;  %v2408_v0 = vld [vmem:[#allocation8 + $0xb4] sm:$0xf0]  ;;  %v1831_v1 = vor.u32 %v2392_v58, %v1830_v57  ;;  %v1843_v2 = vor.u32 %v2393_v56, %v1840_v60 }
  0x50   : > { %680 = vmatpush.bf16.msrb.mxu1 %v1931_v30  ;;  %643 = vmatpush.bf16.msra.mxu2 %v1847_v41  ;;  %v1907_v3 = vor.u32 %v2409_v61, %v1904_v62  ;;  %v2391_v4 = vld [vmem:[#allocation8 + $0x34] sm:$0xf]  ;;  %v1822_v5 = vld [vmem:[#allocation8 + $0x20] sm:$0xf]  ;;  %v2390_v6 = vld [vmem:[#allocation8 + $0x24] sm:$0xf0]  ;;  %v1895_v7 = vor.u32 %v2408_v0, %v1894_v63 }
  0x51   : > { %656 = vmatpush.bf16.msra.mxu3 %v1911_v47  ;;  %v1832_v8 = vld [vmem:[#allocation8 + $0x38] sm:$0xf0]  ;;  %v2407_v9 = vld [vmem:[#allocation8 + $0xb4] sm:$0xf]  ;;  %v1886_v11 = vld [vmem:[#allocation8 + $0xa0] sm:$0xf]  ;;  %v1823_v13 = vor.u32 %v2390_v6, %v1822_v5 }
  0x52   : > { %v1896_v10 = vld [vmem:[#allocation8 + $0xb8] sm:$0xf0]  ;;  %v2406_v12 = vld [vmem:[#allocation8 + $0xa4] sm:$0xf0]  ;;  %v1835_v14 = vor.u32 %v2391_v4, %v1832_v8  ;;  %v2389_v16 = vld [vmem:[#allocation8 + $0x24] sm:$0xf] }
  0x53   : > { %668 = vmatpush.bf16.msrb.mxu0 %v1859_v42  ;;  %v1899_v15 = vor.u32 %v2407_v9, %v1896_v10  ;;  %v1887_v17 = vor.u32 %v2406_v12, %v1886_v11  ;;  %v1824_v18 = vld [vmem:[#allocation8 + $0x28] sm:$0xf0]  ;;  %v2405_v19 = vld [vmem:[#allocation8 + $0xa4] sm:$0xf]  ;;  %v1814_v23 = vld [vmem:[#allocation8 + $0x10] sm:$0xf] }
  0x54   : > { %681 = vmatpush.bf16.msrb.mxu1 %v1923_v43  ;;  %644 = vmatpush.bf16.msra.mxu2 %v1839_v53  ;;  %v1888_v20 = vld [vmem:[#allocation8 + $0xa8] sm:$0xf0]  ;;  %v1827_v21 = vor.u32 %v2389_v16, %v1824_v18  ;;  %v2388_v24 = vld [vmem:[#allocation8 + $0x14] sm:$0xf0]  ;;  %v1878_v25 = vld [vmem:[#allocation8 + $0x90] sm:$0xf] }
  0x55   : > { %657 = vmatpush.bf16.msra.mxu3 %v1903_v59  ;;  %v1891_v22 = vor.u32 %v2405_v19, %v1888_v20  ;;  %v1815_v26 = vor.u32 %v2388_v24, %v1814_v23  ;;  %v2404_v27 = vld [vmem:[#allocation8 + $0x94] sm:$0xf0]  ;;  %v2387_v28 = vld [vmem:[#allocation8 + $0x14] sm:$0xf]  ;;  %v1816_v29 = vld [vmem:[#allocation8 + $0x18] sm:$0xf0] }
  0x56   : > { %v1879_v30 = vor.u32 %v2404_v27, %v1878_v25  ;;  %v1819_v31 = vor.u32 %v2387_v28, %v1816_v29  ;;  %v2403_v32 = vld [vmem:[#allocation8 + $0x94] sm:$0xf]  ;;  %v1880_v33 = vld [vmem:[#allocation8 + $0x98] sm:$0xf0]  ;;  %v1806_v35 = vld [vmem:[#allocation8] sm:$0xf] }
  0x57   : > { %669 = vmatpush.bf16.msrb.mxu0 %v1851_v54  ;;  %v1883_v34 = vor.u32 %v2403_v32, %v1880_v33  ;;  %v2386_v36 = vld [vmem:[#allocation8 + $0x4] sm:$0xf0]  ;;  %v1870_v37 = vld [vmem:[#allocation8 + $0x80] sm:$0xf]  ;;  %v2385_v40 = vld [vmem:[#allocation8 + $0x4] sm:$0xf] }
  0x58   : > { %682 = vmatpush.bf16.msrb.mxu1 %v1915_v55  ;;  %645 = vmatpush.bf16.msra.mxu2 %v1831_v1  ;;  %v1807_v38 = vor.u32 %v2386_v36, %v1806_v35  ;;  %v2402_v39 = vld [vmem:[#allocation8 + $0x84] sm:$0xf0]  ;;  %v1808_v41 = vld [vmem:[#allocation8 + $0x8] sm:$0xf0]  ;;  %v2401_v44 = vld [vmem:[#allocation8 + $0x84] sm:$0xf] }
  0x59   : > { %658 = vmatpush.bf16.msra.mxu3 %v1895_v7  ;;  %v1871_v42 = vor.u32 %v2402_v39, %v1870_v37  ;;  %v1811_v43 = vor.u32 %v2385_v40, %v1808_v41  ;;  %v1872_v45 = vld [vmem:[#allocation8 + $0x88] sm:$0xf0]  ;;  %v2354_v47 = vld [vmem:[#allocation10 + $0x348] sm:$0xf]  ;;  %v2525_v48 = vld [vmem:[#allocation10 + $0x360] sm:$0xf0] }
  0x5a   : > { %v1875_v46 = vor.u32 %v2401_v44, %v1872_v45  ;;  %v2522_v49 = vld [vmem:[#allocation10 + $0x34c] sm:$0xf]  ;;  %v2355_v50 = vor.u32 %v2525_v48, %v2354_v47  ;;  %v2356_v51 = vld [vmem:[#allocation10 + $0x364] sm:$0xf0]  ;;  %v2326_v52 = vld [vmem:[#allocation10 + $0x310] sm:$0xf] }
  0x5b   : > { %670 = vmatpush.bf16.msrb.mxu0 %v1843_v2  ;;  %v2518_v53 = vld [vmem:[#allocation10 + $0x328] sm:$0xf0]  ;;  %v2359_v54 = vor.u32 %v2522_v49, %v2356_v51  ;;  %v2515_v55 = vld [vmem:[#allocation10 + $0x314] sm:$0xf]  ;;  %v2328_v56 = vld [vmem:[#allocation10 + $0x32c] sm:$0xf0] }
  0x5c   : > { %683 = vmatpush.bf16.msrb.mxu1 %v1907_v3  ;;  %646 = vmatpush.bf16.msra.mxu2 %v1823_v13  ;;  %v2130_v57 = vld [vmem:[#allocation10 + $0x188] sm:$0xf]  ;;  %v2327_v58 = vor.u32 %v2518_v53, %v2326_v52  ;;  %v2469_v59 = vld [vmem:[#allocation10 + $0x1a0] sm:$0xf0]  ;;  %v2466_v60 = vld [vmem:[#allocation10 + $0x18c] sm:$0xf]  ;;  %v2331_v62 = vor.u32 %v2515_v55, %v2328_v56 }
  0x5d   : > { %659 = vmatpush.bf16.msra.mxu3 %v1887_v17  ;;  %v2132_v61 = vld [vmem:[#allocation10 + $0x1a4] sm:$0xf0]  ;;  %v2131_v63 = vor.u32 %v2469_v59, %v2130_v57  ;;  %v2298_v1 = vld [vmem:[#allocation10 + $0x2d8] sm:$0xf]  ;;  %v2511_v2 = vld [vmem:[#allocation10 + $0x2f0] sm:$0xf0] }
  0x5e   : > { %v2135_v0 = vor.u32 %v2466_v60, %v2132_v61  ;;  %v2508_v3 = vld [vmem:[#allocation10 + $0x2dc] sm:$0xf]  ;;  %v2300_v4 = vld [vmem:[#allocation10 + $0x2f4] sm:$0xf0]  ;;  %v2102_v5 = vld [vmem:[#allocation10 + $0x150] sm:$0xf]  ;;  %v2299_v10 = vor.u32 %v2511_v2, %v2298_v1 }
  0x5f   : > { %671 = vmatpush.bf16.msrb.mxu0 %v1835_v14  ;;  %v2462_v6 = vld [vmem:[#allocation10 + $0x168] sm:$0xf0]  ;;  %v2459_v8 = vld [vmem:[#allocation10 + $0x154] sm:$0xf]  ;;  %v2104_v9 = vld [vmem:[#allocation10 + $0x16c] sm:$0xf0]  ;;  %v2303_v14 = vor.u32 %v2508_v3, %v2300_v4 }
  0x60   : > { %684 = vmatpush.bf16.msrb.mxu1 %v1899_v15  ;;  %647 = vmatpush.bf16.msra.mxu2 %v1815_v26  ;;  %v2103_v7 = vor.u32 %v2462_v6, %v2102_v5  ;;  %v2107_v11 = vor.u32 %v2459_v8, %v2104_v9  ;;  %v2270_v12 = vld [vmem:[#allocation10 + $0x2a0] sm:$0xf]  ;;  %v2504_v13 = vld [vmem:[#allocation10 + $0x2b8] sm:$0xf0]  ;;  %v2074_v15 = vld [vmem:[#allocation10 + $0x118] sm:$0xf] }
  0x61   : > { %660 = vmatpush.bf16.msra.mxu3 %v1879_v30  ;;  %v2455_v16 = vld [vmem:[#allocation10 + $0x130] sm:$0xf0]  ;;  %v2452_v17 = vld [vmem:[#allocation10 + $0x11c] sm:$0xf]  ;;  %v2501_v18 = vld [vmem:[#allocation10 + $0x2a4] sm:$0xf]  ;;  %v2271_v24 = vor.u32 %v2504_v13, %v2270_v12 }
  0x62   : > { %v2272_v19 = vld [vmem:[#allocation10 + $0x2bc] sm:$0xf0]  ;;  %v2076_v20 = vld [vmem:[#allocation10 + $0x134] sm:$0xf0]  ;;  %v2448_v25 = vld [vmem:[#allocation10 + $0xf8] sm:$0xf0] }
  0x63   : > { %672 = vmatpush.bf16.msrb.mxu0 %v1827_v21  ;;  %v2075_v21 = vor.u32 %v2455_v16, %v2074_v15  ;;  %v2046_v23 = vld [vmem:[#allocation10 + $0xe0] sm:$0xf]  ;;  %v2445_v26 = vld [vmem:[#allocation10 + $0xe4] sm:$0xf]  ;;  %v2275_v28 = vor.u32 %v2501_v18, %v2272_v19  ;;  %v2242_v29 = vld [vmem:[#allocation10 + $0x268] sm:$0xf] }
  0x64   : > { %685 = vmatpush.bf16.msrb.mxu1 %v1891_v22  ;;  %648 = vmatpush.bf16.msra.mxu2 %v1807_v38  ;;  %v2079_v22 = vor.u32 %v2452_v17, %v2076_v20  ;;  %v2048_v27 = vld [vmem:[#allocation10 + $0xfc] sm:$0xf0]  ;;  %v2497_v30 = vld [vmem:[#allocation10 + $0x280] sm:$0xf0]  ;;  %v2244_v32 = vld [vmem:[#allocation10 + $0x284] sm:$0xf0]  ;;  %v2047_v33 = vor.u32 %v2448_v25, %v2046_v23 }
  0x65   : > { %661 = vmatpush.bf16.msra.mxu3 %v1871_v42  ;;  %v2018_v35 = vld [vmem:[#allocation10 + $0xa8] sm:$0xf]  ;;  %v2243_v36 = vor.u32 %v2497_v30, %v2242_v29  ;;  %v2441_v37 = vld [vmem:[#allocation10 + $0xc0] sm:$0xf0]  ;;  %v2438_v38 = vld [vmem:[#allocation10 + $0xac] sm:$0xf] }
  0x66   : > { %v2020_v39 = vld [vmem:[#allocation10 + $0xc4] sm:$0xf0]  ;;  %v2214_v41 = vld [vmem:[#allocation10 + $0x230] sm:$0xf]  ;;  %v2490_v42 = vld [vmem:[#allocation10 + $0x248] sm:$0xf0] }
  0x67   : > { %673 = vmatpush.bf16.msrb.mxu0 %v1819_v31  ;;  %v2494_v31 = vld [vmem:[#allocation10 + $0x26c] sm:$0xf]  ;;  %v2216_v44 = vld [vmem:[#allocation10 + $0x24c] sm:$0xf0]  ;;  %v381_v45 = vld [vmem:[#allocation7] sm:$0x3]  ;;  %v2023_v47 = vor.u32 %v2438_v38, %v2020_v39  ;;  %v2215_v49 = vor.u32 %v2490_v42, %v2214_v41 }
  0x68   : > { %686 = vmatpush.bf16.msrb.mxu1 %v1883_v34  ;;  %1417 = vmatpush.bf16.msrb.mxu2 %v2131_v63  ;;  %v2051_v34 = vor.u32 %v2445_v26, %v2048_v27  ;;  %v2247_v40 = vor.u32 %v2494_v31, %v2244_v32  ;;  %v1990_v48 = vld [vmem:[#allocation10 + $0x70] sm:$0xf]  ;;  %v2431_v51 = vld [vmem:[#allocation10 + $0x74] sm:$0xf]  ;;  %v383_v56 = vperm.slane %v381_v45, 0  ;;  %v384_v57 = vperm.slane %v381_v45, 1 }
  0x69   : > { %1430 = vmatpush.bf16.msrb.mxu3 %v2355_v50  ;;  %v2434_v50 = vld [vmem:[#allocation10 + $0x88] sm:$0xf0]  ;;  %v1992_v52 = vld [vmem:[#allocation10 + $0x8c] sm:$0xf0]  ;;  %v2483_v55 = vld [vmem:[#allocation10 + $0x210] sm:$0xf0] }
  0x6a   : > { %v2188_v59 = vld [vmem:[#allocation10 + $0x214] sm:$0xf0]  ;;  %v1991_v60 = vor.u32 %v2434_v50, %v1990_v48  ;;  %v1995_v61 = vor.u32 %v2431_v51, %v1992_v52  ;;  %v2424_v1 = vld [vmem:[#allocation10 + $0x3c] sm:$0xf]  ;;  %v2158_v6 = vld [vmem:[#allocation10 + $0x1c0] sm:$0xf] }
  0x6b   : > { %674 = vmatpush.bf16.msrb.mxu0 %v1811_v43  ;;  %v2487_v43 = vld [vmem:[#allocation10 + $0x234] sm:$0xf]  ;;  %v1964_v2 = vld [vmem:[#allocation10 + $0x54] sm:$0xf0]  ;;  %v2362_v12 = vld [vmem:[#allocation10 + $0x350] sm:$0xf] }
  0x6c   : > { %687 = vmatpush.bf16.msrb.mxu1 %v1875_v46  ;;  %1418 = vmatpush.bf16.msrb.mxu2 %v2103_v7  ;;  %v2019_v46 = vor.u32 %v2441_v37, %v2018_v35  ;;  %v2219_v53 = vor.u32 %v2487_v43, %v2216_v44  ;;  %v2476_v7 = vld [vmem:[#allocation10 + $0x1d8] sm:$0xf0]  ;;  %v2526_v13 = vld [vmem:[#allocation10 + $0x368] sm:$0xf0]  ;;  %v2523_v15 = vld [vmem:[#allocation10 + $0x354] sm:$0xf]  ;;  %v1967_v17 = vor.u32 %v2424_v1, %v1964_v2 }
  0x6d   : > { %1431 = vmatpush.bf16.msrb.mxu3 %v2327_v58  ;;  %v2480_v58 = vld [vmem:[#allocation10 + $0x1fc] sm:$0xf]  ;;  %v2364_v16 = vld [vmem:[#allocation10 + $0x36c] sm:$0xf0]  ;;  %v1934_v20 = vld [vmem:[#allocation10] sm:$0xf]  ;;  %v2159_v27 = vor.u32 %v2476_v7, %v2158_v6  ;;  %v2363_v32 = vor.u32 %v2526_v13, %v2362_v12 }
  0x6e   : > { %v2191_v5 = vor.u32 %v2480_v58, %v2188_v59  ;;  %v1936_v23 = vld [vmem:[#allocation10 + $0x1c] sm:$0xf0]  ;;  %v2470_v29 = vld [vmem:[#allocation10 + $0x1a8] sm:$0xf0]  ;;  %v2467_v30 = vld [vmem:[#allocation10 + $0x194] sm:$0xf] }
  0x6f   : > { %1443 = vmatpush.bf16.msra.mxu0 %v2135_v0  ;;  %v2427_v0 = vld [vmem:[#allocation10 + $0x50] sm:$0xf0]  ;;  %v2140_v31 = vld [vmem:[#allocation10 + $0x1ac] sm:$0xf0]  ;;  %v2516_v37 = vld [vmem:[#allocation10 + $0x31c] sm:$0xf] }
  0x70   : > { %1456 = vmatpush.bf16.msra.mxu1 %v2359_v54  ;;  %1419 = vmatpush.bf16.msrb.mxu2 %v2075_v21  ;;  %v2186_v54 = vld [vmem:[#allocation10 + $0x1f8] sm:$0xf]  ;;  %v2420_v21 = vld [vmem:[#allocation10 + $0x18] sm:$0xf0]  ;;  %v2519_v35 = vld [vmem:[#allocation10 + $0x330] sm:$0xf0]  ;;  %v2143_v43 = vor.u32 %v2467_v30, %v2140_v31 }
  0x71   : > { %1432 = vmatpush.bf16.msrb.mxu3 %v2299_v10  ;;  %v2187_v63 = vor.u32 %v2483_v55, %v2186_v54  ;;  %v2473_v10 = vld [vmem:[#allocation10 + $0x1c4] sm:$0xf]  ;;  %v2336_v38 = vld [vmem:[#allocation10 + $0x334] sm:$0xf0]  ;;  %v2463_v45 = vld [vmem:[#allocation10 + $0x170] sm:$0xf0] }
  0x72   : > { %v2110_v44 = vld [vmem:[#allocation10 + $0x158] sm:$0xf]  ;;  %v2306_v50 = vld [vmem:[#allocation10 + $0x2e0] sm:$0xf]  ;;  %v2512_v51 = vld [vmem:[#allocation10 + $0x2f8] sm:$0xf0] }
  0x73   : > { %1444 = vmatpush.bf16.msra.mxu0 %v2107_v11  ;;  %v2160_v11 = vld [vmem:[#allocation10 + $0x1dc] sm:$0xf0]  ;;  %v2509_v52 = vld [vmem:[#allocation10 + $0x2e4] sm:$0xf]  ;;  %v2111_v54 = vor.u32 %v2463_v45, %v2110_v44  ;;  %v2280_v1 = vld [vmem:[#allocation10 + $0x2c4] sm:$0xf0] }
  0x74   : > { %1457 = vmatpush.bf16.msra.mxu1 %v2331_v62  ;;  %1420 = vmatpush.bf16.msrb.mxu2 %v2047_v33  ;;  %v1962_v62 = vld [vmem:[#allocation10 + $0x38] sm:$0xf]  ;;  %v2367_v33 = vor.u32 %v2523_v15, %v2364_v16  ;;  %v2453_v58 = vld [vmem:[#allocation10 + $0x124] sm:$0xf]  ;;  %v2084_v59 = vld [vmem:[#allocation10 + $0x13c] sm:$0xf0] }
  0x75   : > { %1433 = vmatpush.bf16.msrb.mxu3 %v2271_v24  ;;  %v2138_v24 = vld [vmem:[#allocation10 + $0x190] sm:$0xf]  ;;  %v2446_v6 = vld [vmem:[#allocation10 + $0xec] sm:$0xf]  ;;  %v2056_v7 = vld [vmem:[#allocation10 + $0x104] sm:$0xf0] }
  0x76   : > { %v2139_v42 = vor.u32 %v2470_v29, %v2138_v24  ;;  %v2495_v12 = vld [vmem:[#allocation10 + $0x274] sm:$0xf]  ;;  %v2252_v13 = vld [vmem:[#allocation10 + $0x28c] sm:$0xf0]  ;;  %v2059_v15 = vor.u32 %v2446_v6, %v2056_v7  ;;  %v2194_v30 = vld [vmem:[#allocation10 + $0x200] sm:$0xf] }
  0x77   : > { %1445 = vmatpush.bf16.msra.mxu0 %v2079_v22  ;;  %v2417_v22 = vld [vmem:[#allocation10 + $0x4] sm:$0xf]  ;;  %v2026_v24 = vld [vmem:[#allocation10 + $0xb0] sm:$0xf]  ;;  %v2484_v31 = vld [vmem:[#allocation10 + $0x218] sm:$0xf0] }
  0x78   : > { %1458 = vmatpush.bf16.msra.mxu1 %v2303_v14  ;;  %1421 = vmatpush.bf16.msrb.mxu2 %v2019_v46  ;;  %v1963_v14 = vor.u32 %v2427_v0, %v1962_v62  ;;  %v1939_v39 = vor.u32 %v2417_v22, %v1936_v23  ;;  %v2460_v46 = vld [vmem:[#allocation10 + $0x15c] sm:$0xf]  ;;  %v2278_v62 = vld [vmem:[#allocation10 + $0x2a8] sm:$0xf]  ;;  %v2502_v0 = vld [vmem:[#allocation10 + $0x2ac] sm:$0xf] }
  0x79   : > { %1434 = vmatpush.bf16.msrb.mxu3 %v2243_v36  ;;  %v1935_v36 = vor.u32 %v2420_v21, %v1934_v20  ;;  %v2488_v21 = vld [vmem:[#allocation10 + $0x23c] sm:$0xf]  ;;  %v2224_v22 = vld [vmem:[#allocation10 + $0x254] sm:$0xf0]  ;;  %v2474_v45 = vld [vmem:[#allocation10 + $0x1cc] sm:$0xf] }
  0x7a   : > { %v2227_v23 = vor.u32 %v2488_v21, %v2224_v22  ;;  %v2372_v6 = vld [vmem:[#allocation10 + $0x374] sm:$0xf0]  ;;  %v2471_v22 = vld [vmem:[#allocation10 + $0x1b0] sm:$0xf0]  ;;  %s3139_s19 = scalar_lea.vmem [#allocation13], %s2529_s15  ;;  %s2530_s20 = smul.u32 56, %s2993_s8 }
  0x7b   : > { %1446 = vmatpush.bf16.msra.mxu0 %v2051_v34  ;;  %v2334_v34 = vld [vmem:[#allocation10 + $0x318] sm:$0xf]  ;;  %s1656_s11 = sshll.u32 %s3139_s19, 4  ;;  %vm1640_vm2 = vcmask 130048   ;;  %s1643_s17 = scalar_lea.sflag [#allocation4], %s3086_s12  ;;  %s1657_s11 = int_to_ptr.vmem [resolvable:$true] %s1656_s11 }
  0x7c   : > { %1459 = vmatpush.bf16.msra.mxu1 %v2275_v28  ;;  %1422 = vmatpush.bf16.msrb.mxu2 %v1991_v60  ;;  %v2163_v28 = vor.u32 %v2473_v10, %v2160_v11  ;;  %v2335_v48 = vor.u32 %v2519_v35, %v2334_v34  ;;  %v2307_v60 = vor.u32 %v2512_v51, %v2306_v50  ;;  %v2250_v10 = vld [vmem:[#allocation10 + $0x270] sm:$0xf]  ;;  %v2498_v11 = vld [vmem:[#allocation10 + $0x288] sm:$0xf0]  ;;  %v2196_v34 = vld [vmem:[#allocation10 + $0x21c] sm:$0xf0]  ;;  %s1654_s28 = scalar_lea.hbm %s3192_s7, %s2530_s20 }
  0x7d   : > { %1435 = vmatpush.bf16.msrb.mxu3 %v2215_v49  ;;  %v2339_v49 = vor.u32 %v2516_v37, %v2336_v38  ;;  %v2251_v16 = vor.u32 %v2498_v11, %v2250_v10  ;;  %v2435_v37 = vld [vmem:[#allocation10 + $0x90] sm:$0xf0]  ;;  %v2425_v51 = vld [vmem:[#allocation10 + $0x44] sm:$0xf]  ;;  %v2146_v21 = vld [vmem:[#allocation10 + $0x198] sm:$0xf] }
  0x7e   : > { %s1658_s16 = sshll.u32 %s1654_s28, 4  ;;  %s2860_s1 = scalar_lea.hbm %s3192_s7, 112  ;;  %s1659_s16 = int_to_ptr.hbm [resolvable:$true] %s1658_s16 }
  0x7f   : > { %1447 = vmatpush.bf16.msra.mxu0 %v2023_v47  ;;  %v2112_v47 = vld [vmem:[#allocation10 + $0x174] sm:$0xf0]  ;;  %s2854_s18 = sshra.s32 %s1659_s16, 4  ;;  %s2855_s18 = int_to_ptr.hbm [resolvable:$true] %s2854_s18 }
  0x80   : > { %1460 = vmatpush.bf16.msra.mxu1 %v2247_v40  ;;  %1423 = vmatpush.bf16.msrb.mxu2 %v1963_v14  ;;  %v2115_v55 = vor.u32 %v2460_v46, %v2112_v47  ;;  %v2168_v46 = vld [vmem:[#allocation10 + $0x1e4] sm:$0xf0]  ;;  %s2856_s13 = scalar_lea.hbm %s2855_s18, 56  ;;  %p2861_p12 = scmp.lt.s32.totalorder %s2855_s18, %s3192_s7 }
  0x81   : > { %1436 = vmatpush.bf16.msrb.mxu3 %v2187_v63  ;;  %v2505_v63 = vld [vmem:[#allocation10 + $0x2c0] sm:$0xf0]  ;;  %v2171_v47 = vor.u32 %v2474_v45, %v2168_v46  ;;  %v2503_v45 = vld [vmem:[#allocation10 + $0x2b4] sm:$0xf]  ;;  %v2288_v46 = vld [vmem:[#allocation10 + $0x2cc] sm:$0xf0]  ;;  %p2857_p1 = scmp.ne.s32.totalorder %s2855_s18, %s2856_s13  ;;  %p2862_p8 = scmp.lt.s32.totalorder %s2860_s1, %s2856_s13 }
  0x83   : > { %1448 = vmatpush.bf16.msra.mxu0 %v1995_v61  ;;  %p2858_p3 = pnand %p2857_p1, %p3055_p13  ;;  %p2863_p7 = por %p2862_p8, %p2861_p12 }
  0x84   : > { %1461 = vmatpush.bf16.msra.mxu1 %v2219_v53  ;;  %1424 = vmatpush.bf16.msrb.mxu2 %v1935_v36  ;;  %v2308_v53 = vld [vmem:[#allocation10 + $0x2fc] sm:$0xf0]  ;;  %v1998_v36 = vld [vmem:[#allocation10 + $0x78] sm:$0xf] }
  0x85   : > { %1437 = vmatpush.bf16.msrb.mxu3 %v2159_v27  ;;  %v2311_v61 = vor.u32 %v2509_v52, %v2308_v53  ;;  %v2439_v27 = vld [vmem:[#allocation10 + $0xb4] sm:$0xf]  ;;  %v1999_v38 = vor.u32 %v2435_v37, %v1998_v36  ;;  %v1972_v52 = vld [vmem:[#allocation10 + $0x5c] sm:$0xf0]  ;;  %p2859_p5 = pneg %p2858_p3 }
  0x86   : > { %v1975_v53 = vor.u32 %v2425_v51, %v1972_v52  ;;  %v2454_v51 = vld [vmem:[#allocation10 + $0x12c] sm:$0xf]  ;;  %v2092_v52 = vld [vmem:[#allocation10 + $0x144] sm:$0xf0] }
  0x87   : > { %1449 = vmatpush.bf16.msra.mxu0 %v1967_v17  ;;  %v2255_v17 = vor.u32 %v2495_v12, %v2252_v13  ;;  %v2342_v13 = vld [vmem:[#allocation10 + $0x320] sm:$0xf]  ;;  %p2864_p9 = pnand %p2863_p7, %p2859_p5 }
  0x88   : > { %1462 = vmatpush.bf16.msra.mxu1 %v2191_v5  ;;  %v2449_v5 = vld [vmem:[#allocation10 + $0x100] sm:$0xf0] }
  0x8b   : > { %1450 = vmatpush.bf16.msra.mxu0 %v1939_v39  ;;  %v2432_v39 = vld [vmem:[#allocation10 + $0x7c] sm:$0xf] }
  0x8c   : > { %1463 = vmatpush.bf16.msra.mxu1 %v2163_v28  ;;  %v2028_v28 = vld [vmem:[#allocation10 + $0xcc] sm:$0xf0] }
  0x8d   : > { %v2031_v29 = vor.u32 %v2439_v27, %v2028_v28  ;;  %v2314_v28 = vld [vmem:[#allocation10 + $0x2e8] sm:$0xf] }
  0xcb   : > { %v422_v3 = vpop.f32.mrf.mxu0 }
  0xcc   : > { %v435_v4 = vpop.f32.mrf.mxu1  ;;  %v423_v8 = vadd.f32 %v422_v3, %v383_v56  ;;  %v2082_v56 = vld [vmem:[#allocation10 + $0x120] sm:$0xf]  ;;  %v2087_v3 = vor.u32 %v2453_v58, %v2084_v59  ;;  %v1944_v58 = vld [vmem:[#allocation10 + $0x24] sm:$0xf0] }
  0xcd   : > { %v436_v9 = vadd.f32 %v435_v4, %v384_v57  ;;  %v2456_v57 = vld [vmem:[#allocation10 + $0x138] sm:$0xf0]  ;;  %v2054_v4 = vld [vmem:[#allocation10 + $0xe8] sm:$0xf] }
  0xce   : > { %v439_v18 = vmax.f32 %v423_v8, 0.0  ;;  %v2083_v2 = vor.u32 %v2456_v57, %v2082_v56  ;;  %v2279_v8 = vor.u32 %v2505_v63, %v2278_v62  ;;  %v2055_v14 = vor.u32 %v2449_v5, %v2054_v4  ;;  %v2418_v57 = vld [vmem:[#allocation10 + $0xc] sm:$0xf]  ;;  %v2527_v4 = vld [vmem:[#allocation10 + $0x370] sm:$0xf0] }
  0xcf   : > { %v440_v19 = vmax.f32 %v436_v9, 0.0  ;;  %v2283_v9 = vor.u32 %v2502_v0, %v2280_v1  ;;  %v1947_v59 = vor.u32 %v2418_v57, %v1944_v58  ;;  %v2524_v5 = vld [vmem:[#allocation10 + $0x35c] sm:$0xf]  ;;  %v2260_v58 = vld [vmem:[#allocation10 + $0x294] sm:$0xf0] }
  0xd0   : > { %v441_v25 = vpack.c.bf16 %v439_v18, %v439_v18  ;;  %v2222_v18 = vld [vmem:[#allocation10 + $0x238] sm:$0xf]  ;;  %v2375_v12 = vor.u32 %v2524_v5, %v2372_v6  ;;  %v2496_v57 = vld [vmem:[#allocation10 + $0x27c] sm:$0xf]  ;;  %v2489_v5 = vld [vmem:[#allocation10 + $0x244] sm:$0xf] }
  0xd1   : > { %v442_v26 = vpack.c.bf16 %v440_v19, %v440_v19  ;;  %v2491_v19 = vld [vmem:[#allocation10 + $0x250] sm:$0xf0]  ;;  %v2232_v6 = vld [vmem:[#allocation10 + $0x25c] sm:$0xf0] }
  0xd2   : > { %649 = vmatmul.bf16.vlgmr.msra.gmra.mxu2 %v441_v25  ;;  %675 = vmatmul.bf16.vlgmr.msrb.gmra.mxu0 %v441_v25  ;;  %v2223_v20 = vor.u32 %v2491_v19, %v2222_v18  ;;  %v2442_v25 = vld [vmem:[#allocation10 + $0xc8] sm:$0xf0] }
  0xd3   : > { %662 = vmatmul.bf16.vlgmr.msra.gmra.mxu3 %v442_v26  ;;  %688 = vmatmul.bf16.vlgmr.msrb.gmra.mxu1 %v442_v26  ;;  %v424_v40 = vpop.f32.mrf.mxu0  ;;  %v2027_v26 = vor.u32 %v2442_v25, %v2026_v24  ;;  %v2148_v24 = vld [vmem:[#allocation10 + $0x1b4] sm:$0xf0] }
  0xd4   : > { %v437_v41 = vpop.f32.mrf.mxu1  ;;  %1482 = vmatpush.bf16.msra.mxu3 %v2363_v32  ;;  %1508 = vmatpush.bf16.msrb.mxu1 %v2367_v33  ;;  %v2195_v32 = vor.u32 %v2484_v31, %v2194_v30  ;;  %v2481_v33 = vld [vmem:[#allocation10 + $0x204] sm:$0xf]  ;;  %v2000_v40 = vld [vmem:[#allocation10 + $0x94] sm:$0xf0]  ;;  %v2510_v30 = vld [vmem:[#allocation10 + $0x2ec] sm:$0xf] }
  0xd5   : > { %1469 = vmatpush.bf16.msra.mxu2 %v2139_v42  ;;  %1495 = vmatpush.bf16.msrb.mxu0 %v2143_v43  ;;  %v2199_v35 = vor.u32 %v2481_v33, %v2196_v34  ;;  %v2003_v41 = vor.u32 %v2432_v39, %v2000_v40  ;;  %v2166_v42 = vld [vmem:[#allocation10 + $0x1c8] sm:$0xf]  ;;  %v2477_v43 = vld [vmem:[#allocation10 + $0x1e0] sm:$0xf0]  ;;  %v2147_v33 = vor.u32 %v2471_v22, %v2146_v21  ;;  %v2120_v40 = vld [vmem:[#allocation10 + $0x17c] sm:$0xf0] }
  0xd6   : > { %v2167_v44 = vor.u32 %v2477_v43, %v2166_v42  ;;  %v2316_v31 = vld [vmem:[#allocation10 + $0x304] sm:$0xf0]  ;;  %v2461_v39 = vld [vmem:[#allocation10 + $0x164] sm:$0xf]  ;;  %v2286_v43 = vld [vmem:[#allocation10 + $0x2b0] sm:$0xf] }
  0xd7   : > { %v2319_v42 = vor.u32 %v2510_v30, %v2316_v31  ;;  %v2006_v22 = vld [vmem:[#allocation10 + $0x80] sm:$0xf]  ;;  %v2475_v30 = vld [vmem:[#allocation10 + $0x1d4] sm:$0xf]  ;;  %v2176_v31 = vld [vmem:[#allocation10 + $0x1ec] sm:$0xf0] }
  0xd8   : > { %1483 = vmatpush.bf16.msra.mxu3 %v2335_v48  ;;  %1509 = vmatpush.bf16.msrb.mxu1 %v2339_v49  ;;  %v1970_v48 = vld [vmem:[#allocation10 + $0x40] sm:$0xf]  ;;  %v2428_v49 = vld [vmem:[#allocation10 + $0x58] sm:$0xf0] }
  0xd9   : > { %1470 = vmatpush.bf16.msra.mxu2 %v2111_v54  ;;  %1496 = vmatpush.bf16.msrb.mxu0 %v2115_v55  ;;  %v1971_v50 = vor.u32 %v2428_v49, %v1970_v48  ;;  %v1942_v54 = vld [vmem:[#allocation10 + $0x8] sm:$0xf]  ;;  %v2421_v55 = vld [vmem:[#allocation10 + $0x20] sm:$0xf0]  ;;  %v2123_v48 = vor.u32 %v2461_v39, %v2120_v40  ;;  %v2426_v39 = vld [vmem:[#allocation10 + $0x4c] sm:$0xf] }
  0xda   : > { %v1943_v56 = vor.u32 %v2421_v55, %v1942_v54  ;;  %v2090_v49 = vld [vmem:[#allocation10 + $0x128] sm:$0xf]  ;;  %v2291_v54 = vor.u32 %v2503_v45, %v2288_v46  ;;  %v2258_v55 = vld [vmem:[#allocation10 + $0x278] sm:$0xf] }
  0xdb   : > { %v1980_v40 = vld [vmem:[#allocation10 + $0x64] sm:$0xf0] }
  0xdc   : > { %1484 = vmatpush.bf16.msra.mxu3 %v2307_v60  ;;  %1510 = vmatpush.bf16.msrb.mxu1 %v2311_v61  ;;  %v475_v60 = vld [vmem:[%s3189_s4] sm:$0x3]  ;;  %v1983_v45 = vor.u32 %v2426_v39, %v1980_v40  ;;  %v2350_v46 = vld [vmem:[#allocation10 + $0x328] sm:$0xf] }
  0xdd   : > { %1471 = vmatpush.bf16.msra.mxu2 %v2083_v2  ;;  %1497 = vmatpush.bf16.msrb.mxu0 %v2087_v3  ;;  %v478_v61 = vperm.slane %v475_v60, 1  ;;  %v477_v1 = vperm.slane %v475_v60, 0  ;;  %v2370_v2 = vld [vmem:[#allocation10 + $0x358] sm:$0xf]  ;;  %v2095_v60 = vor.u32 %v2454_v51, %v2092_v52  ;;  %v1952_v51 = vld [vmem:[#allocation10 + $0x2c] sm:$0xf0] }
  0xde   : > { %v2371_v11 = vor.u32 %v2527_v4, %v2370_v2  ;;  %v2263_v2 = vor.u32 %v2496_v57, %v2260_v58  ;;  %v2492_v4 = vld [vmem:[#allocation10 + $0x258] sm:$0xf0]  ;;  %v2154_v52 = vld [vmem:[#allocation10 + $0x1a0] sm:$0xf]  ;;  %v2322_v57 = vld [vmem:[#allocation10 + $0x2f0] sm:$0xf] }
  0xdf   : > { %v2514_v58 = vld [vmem:[#allocation10 + $0x308] sm:$0xf0] }
  0xe0   : > { %1485 = vmatpush.bf16.msra.mxu3 %v2279_v8  ;;  %1511 = vmatpush.bf16.msrb.mxu1 %v2283_v9 }
  0xe1   : > { %1472 = vmatpush.bf16.msra.mxu2 %v2055_v14  ;;  %1498 = vmatpush.bf16.msrb.mxu0 %v2059_v15  ;;  %v2520_v15 = vld [vmem:[#allocation10 + $0x338] sm:$0xf0] }
  0xe4   : > { %1486 = vmatpush.bf16.msra.mxu3 %v2251_v16  ;;  %1512 = vmatpush.bf16.msrb.mxu1 %v2255_v17  ;;  %v2517_v16 = vld [vmem:[#allocation10 + $0x324] sm:$0xf]  ;;  %v2344_v17 = vld [vmem:[#allocation10 + $0x33c] sm:$0xf0] }
  0xe5   : > { %1473 = vmatpush.bf16.msra.mxu2 %v2027_v26  ;;  %1499 = vmatpush.bf16.msrb.mxu0 %v2031_v29  ;;  %v2343_v26 = vor.u32 %v2520_v15, %v2342_v13  ;;  %v2347_v27 = vor.u32 %v2517_v16, %v2344_v17  ;;  %v2513_v29 = vld [vmem:[#allocation10 + $0x300] sm:$0xf0]  ;;  %v2235_v15 = vor.u32 %v2489_v5, %v2232_v6  ;;  %v2202_v16 = vld [vmem:[#allocation10 + $0x208] sm:$0xf]  ;;  %v2266_v5 = vld [vmem:[#allocation10 + $0x280] sm:$0xf] }
  0xe6   : > { %v2485_v17 = vld [vmem:[#allocation10 + $0x220] sm:$0xf0]  ;;  %v2500_v6 = vld [vmem:[#allocation10 + $0x298] sm:$0xf0] }
  0xe8   : > { %1487 = vmatpush.bf16.msra.mxu3 %v2223_v20  ;;  %1513 = vmatpush.bf16.msrb.mxu1 %v2227_v23  ;;  %v2468_v23 = vld [vmem:[#allocation10 + $0x19c] sm:$0xf] }
  0xe9   : > { %1474 = vmatpush.bf16.msra.mxu2 %v1999_v38  ;;  %1500 = vmatpush.bf16.msrb.mxu0 %v2003_v41  ;;  %v2151_v34 = vor.u32 %v2468_v23, %v2148_v24  ;;  %v2464_v38 = vld [vmem:[#allocation10 + $0x178] sm:$0xf0]  ;;  %v2315_v41 = vor.u32 %v2513_v29, %v2314_v28  ;;  %v2433_v24 = vld [vmem:[#allocation10 + $0x84] sm:$0xf]  ;;  %v2174_v28 = vld [vmem:[#allocation10 + $0x1d0] sm:$0xf] }
  0xea   : > { %v2436_v23 = vld [vmem:[#allocation10 + $0x98] sm:$0xf0]  ;;  %v2478_v29 = vld [vmem:[#allocation10 + $0x1e8] sm:$0xf0] }
  0xec   : > { %1488 = vmatpush.bf16.msra.mxu3 %v2195_v32  ;;  %1514 = vmatpush.bf16.msrb.mxu1 %v2199_v35  ;;  %v2118_v35 = vld [vmem:[#allocation10 + $0x160] sm:$0xf] }
  0xed   : > { %1475 = vmatpush.bf16.msra.mxu2 %v1971_v50  ;;  %1501 = vmatpush.bf16.msrb.mxu0 %v1975_v53  ;;  %v2457_v50 = vld [vmem:[#allocation10 + $0x140] sm:$0xf0] }
  0xf0   : > { %1489 = vmatpush.bf16.msra.mxu3 %v2167_v44  ;;  %1515 = vmatpush.bf16.msrb.mxu1 %v2171_v47  ;;  %v2506_v44 = vld [vmem:[#allocation10 + $0x2c8] sm:$0xf0]  ;;  %v2119_v47 = vor.u32 %v2464_v38, %v2118_v35  ;;  %v2378_v35 = vld [vmem:[#allocation10 + $0x360] sm:$0xf]  ;;  %v2429_v38 = vld [vmem:[#allocation10 + $0x60] sm:$0xf0] }
  0xf1   : > { %1476 = vmatpush.bf16.msra.mxu2 %v1943_v56  ;;  %1502 = vmatpush.bf16.msrb.mxu0 %v1947_v59  ;;  %v2287_v53 = vor.u32 %v2506_v44, %v2286_v43  ;;  %v2499_v56 = vld [vmem:[#allocation10 + $0x290] sm:$0xf0]  ;;  %v2091_v59 = vor.u32 %v2457_v50, %v2090_v49  ;;  %v2422_v49 = vld [vmem:[#allocation10 + $0x28] sm:$0xf0] }
  0xf2   : > { %v2419_v50 = vld [vmem:[#allocation10 + $0x14] sm:$0xf] }
 0x14f   : > { %v676_v62 = vpop.f32.mrf.mxu0 }
 0x150   : > { %v689_v63 = vpop.f32.mrf.mxu1  ;;  %v677_v0 = vadd.f32 %v676_v62, %v478_v61  ;;  %v2062_v61 = vld [vmem:[#allocation10 + $0xf0] sm:$0xf]  ;;  %v2450_v62 = vld [vmem:[#allocation10 + $0x108] sm:$0xf0] }
 0x152   : > { %v690_v3 = vadd.f32 %v689_v63, %v677_v0  ;;  %v2447_v63 = vld [vmem:[#allocation10 + $0xf4] sm:$0xf]  ;;  %v2064_v0 = vld [vmem:[#allocation10 + $0x10c] sm:$0xf0] }
 0x154   : > { %v694_v7 = vmax.f32 %v690_v3, 0.0  ;;  %v2230_v3 = vld [vmem:[#allocation10 + $0x240] sm:$0xf] }
 0x155   : > { %v650_v8 = vpop.f32.mrf.mxu2  ;;  %v2231_v13 = vor.u32 %v2492_v4, %v2230_v3  ;;  %v2458_v3 = vld [vmem:[#allocation10 + $0x148] sm:$0xf0] }
 0x156   : > { %v663_v9 = vpop.f32.mrf.mxu3  ;;  %v651_v10 = vadd.f32 %v650_v8, %v477_v1  ;;  %v3114_v14 = vpack.c.bf16 %v694_v7, %v694_v7  ;;  %v2259_v1 = vor.u32 %v2499_v56, %v2258_v55  ;;  %v2063_v7 = vor.u32 %v2450_v62, %v2062_v61  ;;  %v2465_v61 = vld [vmem:[#allocation10 + $0x180] sm:$0xf0] }
 0x157   : > { %v678_v19 = vpop.f32.mrf.mxu0  ;;  %v2067_v8 = vor.u32 %v2447_v63, %v2064_v0  ;;  %v1955_v56 = vor.u32 %v2419_v50, %v1952_v51  ;;  %v2323_v62 = vor.u32 %v2514_v58, %v2322_v57  ;;  %v2294_v63 = vld [vmem:[#allocation10 + $0x2b8] sm:$0xf]  ;;  %v2507_v0 = vld [vmem:[#allocation10 + $0x2d0] sm:$0xf0] }
 0x158   : > { %v664_v18 = vadd.f32 %v663_v9, %v651_v10  ;;  %v691_v20 = vpop.f32.mrf.mxu1  ;;  %1438 = vmatmul.bf16.vlgmr.msrb.gmra.mxu3 %v3114_v14  ;;  %1464 = vmatmul.bf16.vlgmr.msra.gmra.mxu1 %v3114_v14  ;;  %v2034_v9 = vld [vmem:[#allocation10 + $0xb8] sm:$0xf]  ;;  %v2443_v10 = vld [vmem:[#allocation10 + $0xd0] sm:$0xf0]  ;;  %v2204_v19 = vld [vmem:[#allocation10 + $0x224] sm:$0xf0]  ;;  %v2295_v4 = vor.u32 %v2507_v0, %v2294_v63 }
 0x159   : > { %1534 = vmatpush.bf16.msrb.mxu3 %v2371_v11  ;;  %1560 = vmatpush.bf16.msra.mxu1 %v2375_v12  ;;  %v2440_v11 = vld [vmem:[#allocation10 + $0xbc] sm:$0xf]  ;;  %v2036_v12 = vld [vmem:[#allocation10 + $0xd4] sm:$0xf0]  ;;  %v2035_v20 = vor.u32 %v2443_v10, %v2034_v9  ;;  %v2451_v9 = vld [vmem:[#allocation10 + $0x110] sm:$0xf0]  ;;  %v2267_v10 = vor.u32 %v2500_v6, %v2266_v5 }
 0x15a   : > { %v693_v25 = vmax.f32 %v664_v18, 0.0  ;;  %v2482_v18 = vld [vmem:[#allocation10 + $0x20c] sm:$0xf]  ;;  %v2039_v21 = vor.u32 %v2440_v11, %v2036_v12  ;;  %v2238_v11 = vld [vmem:[#allocation10 + $0x248] sm:$0xf] }
 0x15b   : > { %v2493_v12 = vld [vmem:[#allocation10 + $0x260] sm:$0xf0] }
 0x15c   : > { %v3118_v32 = vpack.c.bf16 %v693_v25, %v693_v25  ;;  %v2008_v25 = vld [vmem:[#allocation10 + $0x9c] sm:$0xf0] }
 0x15d   : > { %v652_v36 = vpop.f32.mrf.mxu2  ;;  %1535 = vmatpush.bf16.msrb.mxu3 %v2343_v26  ;;  %1561 = vmatpush.bf16.msra.mxu1 %v2347_v27  ;;  %v2203_v26 = vor.u32 %v2485_v17, %v2202_v16  ;;  %v2207_v27 = vor.u32 %v2482_v18, %v2204_v19  ;;  %v2444_v16 = vld [vmem:[#allocation10 + $0xd8] sm:$0xf0]  ;;  %v2239_v17 = vor.u32 %v2493_v12, %v2238_v11  ;;  %v2210_v18 = vld [vmem:[#allocation10 + $0x210] sm:$0xf]  ;;  %v2486_v19 = vld [vmem:[#allocation10 + $0x228] sm:$0xf0] }
 0x15e   : > { %v665_v37 = vpop.f32.mrf.mxu3  ;;  %1425 = vmatmul.bf16.vlgmr.msrb.gmra.mxu2 %v3118_v32  ;;  %1451 = vmatmul.bf16.vlgmr.msra.gmra.mxu0 %v3118_v32  ;;  %v2528_v36 = vld [vmem:[#allocation10 + $0x378] sm:$0xf0] }
 0x15f   : > { %1521 = vmatpush.bf16.msrb.mxu2 %v2147_v33  ;;  %1547 = vmatpush.bf16.msra.mxu0 %v2151_v34  ;;  %v2007_v33 = vor.u32 %v2436_v23, %v2006_v22  ;;  %v2011_v34 = vor.u32 %v2433_v24, %v2008_v25  ;;  %v1978_v37 = vld [vmem:[#allocation10 + $0x48] sm:$0xf]  ;;  %v2379_v43 = vor.u32 %v2528_v36, %v2378_v35  ;;  %v2437_v22 = vld [vmem:[#allocation10 + $0xa0] sm:$0xf0]  ;;  %v2182_v24 = vld [vmem:[#allocation10 + $0x1d8] sm:$0xf] }
 0x160   : > { %v1979_v44 = vor.u32 %v2429_v38, %v1978_v37  ;;  %v2211_v23 = vor.u32 %v2486_v19, %v2210_v18  ;;  %v2479_v25 = vld [vmem:[#allocation10 + $0x1f0] sm:$0xf0]  ;;  %v3132_v36 = vld [vmem:[#allocation11] sm:$0xff] }
 0x161   : > { %1536 = vmatpush.bf16.msrb.mxu3 %v2315_v41  ;;  %1562 = vmatpush.bf16.msra.mxu1 %v2319_v42  ;;  %v2175_v41 = vor.u32 %v2478_v29, %v2174_v28  ;;  %v2179_v42 = vor.u32 %v2475_v30, %v2176_v31  ;;  %v2430_v28 = vld [vmem:[#allocation10 + $0x68] sm:$0xf0]  ;;  %v2183_v29 = vor.u32 %v2479_v25, %v2182_v24  ;;  %v1958_v31 = vld [vmem:[#allocation10 + $0x18] sm:$0xf]  ;;  %v828_v37 = vperm.slane %v3132_v36, 1 }
 0x163   : > { %1522 = vmatpush.bf16.msrb.mxu2 %v2119_v47  ;;  %1548 = vmatpush.bf16.msra.mxu0 %v2123_v48  ;;  %v2521_v47 = vld [vmem:[#allocation10 + $0x340] sm:$0xf0]  ;;  %v1950_v48 = vld [vmem:[#allocation10 + $0x10] sm:$0xf] }
 0x164   : > { %v1951_v55 = vor.u32 %v2422_v49, %v1950_v48 }
 0x165   : > { %1537 = vmatpush.bf16.msrb.mxu3 %v2287_v53  ;;  %1563 = vmatpush.bf16.msra.mxu1 %v2291_v54  ;;  %v2472_v53 = vld [vmem:[#allocation10 + $0x1b8] sm:$0xf0]  ;;  %v2351_v54 = vor.u32 %v2521_v47, %v2350_v46 }
 0x167   : > { %1523 = vmatpush.bf16.msrb.mxu2 %v2091_v59  ;;  %1549 = vmatpush.bf16.msra.mxu0 %v2095_v60  ;;  %v2155_v59 = vor.u32 %v2472_v53, %v2154_v52  ;;  %v2126_v60 = vld [vmem:[#allocation10 + $0x168] sm:$0xf]  ;;  %v830_v52 = vperm.slane %v3132_v36, 3 }
 0x168   : > { %1490 = vmatmul.bf16.vlgmr.msra.gmra.mxu3 %v3114_v14  ;;  %1516 = vmatmul.bf16.vlgmr.msrb.gmra.mxu1 %v3114_v14 }
 0x169   : > { %1538 = vmatpush.bf16.msrb.mxu3 %v2259_v1  ;;  %1564 = vmatpush.bf16.msra.mxu1 %v2263_v2  ;;  %v2127_v1 = vor.u32 %v2465_v61, %v2126_v60  ;;  %v2098_v2 = vld [vmem:[#allocation10 + $0x130] sm:$0xf]  ;;  %v829_v61 = vperm.slane %v3132_v36, 2 }
 0x16b   : > { %1524 = vmatpush.bf16.msrb.mxu2 %v2063_v7  ;;  %1550 = vmatpush.bf16.msra.mxu0 %v2067_v8  ;;  %v2099_v7 = vor.u32 %v2458_v3, %v2098_v2  ;;  %v2070_v8 = vld [vmem:[#allocation10 + $0xf8] sm:$0xf] }
 0x16d   : > { %1539 = vmatpush.bf16.msrb.mxu3 %v2231_v13  ;;  %1565 = vmatpush.bf16.msra.mxu1 %v2235_v15  ;;  %v2071_v13 = vor.u32 %v2451_v9, %v2070_v8  ;;  %v2042_v15 = vld [vmem:[#allocation10 + $0xc0] sm:$0xf] }
 0x16e   : > { %1477 = vmatmul.bf16.vlgmr.msra.gmra.mxu2 %v3118_v32  ;;  %1503 = vmatmul.bf16.vlgmr.msrb.gmra.mxu0 %v3118_v32 }
 0x16f   : > { %1525 = vmatpush.bf16.msrb.mxu2 %v2035_v20  ;;  %1551 = vmatpush.bf16.msra.mxu0 %v2039_v21  ;;  %v2043_v20 = vor.u32 %v2444_v16, %v2042_v15  ;;  %v2014_v21 = vld [vmem:[#allocation10 + $0x88] sm:$0xf] }
 0x171   : > { %1540 = vmatpush.bf16.msrb.mxu3 %v2203_v26  ;;  %1566 = vmatpush.bf16.msra.mxu1 %v2207_v27  ;;  %v2015_v26 = vor.u32 %v2437_v22, %v2014_v21  ;;  %v1986_v27 = vld [vmem:[#allocation10 + $0x50] sm:$0xf]  ;;  %v831_v21 = vperm.slane %v3132_v36, 4 }
 0x172   : > { %v1987_v30 = vor.u32 %v2430_v28, %v1986_v27 }
 0x173   : > { %1526 = vmatpush.bf16.msrb.mxu2 %v2007_v33  ;;  %1552 = vmatpush.bf16.msra.mxu0 %v2011_v34  ;;  %v2423_v33 = vld [vmem:[#allocation10 + $0x30] sm:$0xf0] }
 0x174   : > { %v1959_v34 = vor.u32 %v2423_v33, %v1958_v31 }
 0x175   : > { %1541 = vmatpush.bf16.msrb.mxu3 %v2175_v41  ;;  %1567 = vmatpush.bf16.msra.mxu1 %v2179_v42 }
 0x177   : > { %1527 = vmatpush.bf16.msrb.mxu2 %v1979_v44  ;;  %1553 = vmatpush.bf16.msra.mxu0 %v1983_v45 }
 0x178   : > { %1542 = vmatmul.bf16.vlgmr.msrb.gmra.mxu3 %v3114_v14  ;;  %1568 = vmatmul.bf16.vlgmr.msra.gmra.mxu1 %v3114_v14 }
 0x179   : > { %1586 = vmatpush.bf16.msra.mxu3 %v2379_v43  ;;  %v827_v43 = vperm.slane %v3132_v36, 0 }
 0x17b   : > { %1528 = vmatpush.bf16.msrb.mxu2 %v1951_v55  ;;  %1554 = vmatpush.bf16.msra.mxu0 %v1955_v56 }
 0x17d   : > { %1587 = vmatpush.bf16.msra.mxu3 %v2351_v54 }
 0x17e   : > { %1529 = vmatmul.bf16.vlgmr.msrb.gmra.mxu2 %v3118_v32  ;;  %1555 = vmatmul.bf16.vlgmr.msra.gmra.mxu0 %v3118_v32 }
 0x17f   : > { %1573 = vmatpush.bf16.msra.mxu2 %v2155_v59 }
 0x181   : > { %1588 = vmatpush.bf16.msra.mxu3 %v2323_v62 }
 0x183   : > { %1574 = vmatpush.bf16.msra.mxu2 %v2127_v1 }
 0x185   : > { %1589 = vmatpush.bf16.msra.mxu3 %v2295_v4 }
 0x187   : > { %1575 = vmatpush.bf16.msra.mxu2 %v2099_v7 }
 0x189   : > { %1590 = vmatpush.bf16.msra.mxu3 %v2267_v10 }
 0x18b   : > { %1576 = vmatpush.bf16.msra.mxu2 %v2071_v13  ;;  %v832_v13 = vperm.slane %v3132_v36, 5 }
 0x18d   : > { %1591 = vmatpush.bf16.msra.mxu3 %v2239_v17 }
 0x18f   : > { %1577 = vmatpush.bf16.msra.mxu2 %v2043_v20 }
 0x191   : > { %1592 = vmatpush.bf16.msra.mxu3 %v2211_v23 }
 0x193   : > { %1578 = vmatpush.bf16.msra.mxu2 %v2015_v26 }
 0x195   : > { %1593 = vmatpush.bf16.msra.mxu3 %v2183_v29 }
 0x197   : > { %1579 = vmatpush.bf16.msra.mxu2 %v1987_v30 }
 0x198   : > { %1594 = vmatmul.bf16.vlgmr.msra.gmra.mxu3 %v3114_v14 }
 0x19b   : > { %1580 = vmatpush.bf16.msra.mxu2 %v1959_v34 }
 0x19e   : > { %1581 = vmatmul.bf16.vlgmr.msra.gmra.mxu2 %v3118_v32 }
 0x1d5   : > { %v1465_v35 = vpop.f32.mrf.mxu1 }
 0x1db   : > { %v1439_v38 = vpop.f32.mrf.mxu3  ;;  %v1452_v39 = vpop.f32.mrf.mxu0 }
 0x1dc   : > { %v1453_v40 = vadd.f32 %v1452_v39, %v828_v37 }
 0x1dd   : > { %v1467_v41 = vpop.f32.mrf.mxu1 }
 0x1de   : > { %v1466_v42 = vadd.f32 %v1465_v35, %v1453_v40 }
 0x1e0   : > { %v1600_v44 = vsub.f32 0.0, %v1466_v42 }
 0x1e1   : > { %v1426_v45 = vpop.f32.mrf.mxu2 }
 0x1e2   : > { %v1608_v46 = vmul.f32 1.442695, %v1600_v44  ;;  %v1427_v47 = vadd.f32 %v1426_v45, %v827_v43 }
 0x1e3   : > { %v1441_v14 = vpop.f32.mrf.mxu3  ;;  %v1454_v48 = vpop.f32.mrf.mxu0 }
 0x1e4   : > { %2632 = vpow2.f32 %v1608_v46  ;;  %v1440_v32 = vadd.f32 %v1439_v38, %v1427_v47  ;;  %v833_v46 = vperm.slane %v3132_v36, 6 }
 0x1e5   : > { %v1517_v49 = vpop.f32.mrf.mxu1 }
 0x1e6   : > { %v1599_v50 = vsub.f32 0.0, %v1440_v32 }
 0x1e8   : > { %v1606_v51 = vmul.f32 1.442695, %v1599_v50 }
 0x1e9   : > { %v1428_v53 = vpop.f32.mrf.mxu2 }
 0x1ea   : > { %v2633_v54 = vpop.eup %2632  ;;  %2634 = vpow2.f32 %v1606_v51 }
 0x1eb   : > { %v1621_v55 = vadd.f32 1.0, %v2633_v54  ;;  %v1491_v56 = vpop.f32.mrf.mxu3  ;;  %v1504_v57 = vpop.f32.mrf.mxu0 }
 0x1ec   : > { %v1505_v58 = vadd.f32 %v1504_v57, %v830_v52 }
 0x1ed   : > { %2636 = vrcp.f32 %v1621_v55  ;;  %v1519_v59 = vpop.f32.mrf.mxu1 }
 0x1ee   : > { %v1518_v60 = vadd.f32 %v1517_v49, %v1505_v58 }
 0x1f0   : > { %v2635_v62 = vpop.eup %2634  ;;  %v1602_v63 = vsub.f32 0.0, %v1518_v60 }
 0x1f1   : > { %v1620_v0 = vadd.f32 1.0, %v2635_v62  ;;  %v1478_v1 = vpop.f32.mrf.mxu2 }
 0x1f2   : > { %v1612_v2 = vmul.f32 1.442695, %v1602_v63  ;;  %v1479_v3 = vadd.f32 %v1478_v1, %v829_v61 }
 0x1f3   : > { %v2637_v4 = vpop.eup %2636  ;;  %2638 = vrcp.f32 %v1620_v0  ;;  %v1493_v5 = vpop.f32.mrf.mxu3 }
 0x1f4   : > { %v1506_v6 = vpop.f32.mrf.mxu0  ;;  %1635 = vst [vmem:[%s3139_s19 + $0x8] sm:$0xff] %v2637_v4  ;;  %2640 = vpow2.f32 %v1612_v2  ;;  %v1492_v7 = vadd.f32 %v1491_v56, %v1479_v3 }
 0x1f5   : > { %v1569_v8 = vpop.f32.mrf.mxu1 }
 0x1f6   : > { %v1601_v9 = vsub.f32 0.0, %v1492_v7 }
 0x1f8   : > { %v1610_v10 = vmul.f32 1.442695, %v1601_v9 }
 0x1f9   : > { %v2639_v11 = vpop.eup %2638  ;;  %v1480_v12 = vpop.f32.mrf.mxu2 }
 0x1fa   : > { %v2641_v15 = vpop.eup %2640  ;;  %1634 = vst [vmem:[%s3139_s19] sm:$0xff] %v2639_v11  ;;  %2642 = vpow2.f32 %v1610_v10 }
 0x1fb   : > { %v1623_v16 = vadd.f32 1.0, %v2641_v15  ;;  %v1543_v17 = vpop.f32.mrf.mxu3 }
 0x1fc   : > { %v1556_v18 = vpop.f32.mrf.mxu0 }
 0x1fd   : > { %2644 = vrcp.f32 %v1623_v16  ;;  %v1557_v19 = vadd.f32 %v1556_v18, %v832_v13  ;;  %v1571_v20 = vpop.f32.mrf.mxu1 }
 0x1ff   : > { %v1570_v22 = vadd.f32 %v1569_v8, %v1557_v19 }
 0x200   : > { %v2643_v23 = vpop.eup %2642 }
 0x201   : > { %v1622_v24 = vadd.f32 1.0, %v2643_v23  ;;  %v1604_v25 = vsub.f32 0.0, %v1570_v22  ;;  %v1530_v26 = vpop.f32.mrf.mxu2 }
 0x202   : > { %v1531_v27 = vadd.f32 %v1530_v26, %v831_v21 }
 0x203   : > { %v2645_v28 = vpop.eup %2644  ;;  %2646 = vrcp.f32 %v1622_v24  ;;  %v1616_v29 = vmul.f32 1.442695, %v1604_v25  ;;  %v1545_v30 = vpop.f32.mrf.mxu3 }
 0x204   : > { %1637 = vst [vmem:[%s3139_s19 + $0x18] sm:$0xff] %v2645_v28  ;;  %v1544_v31 = vadd.f32 %v1543_v17, %v1531_v27  ;;  %v1558_v33 = vpop.f32.mrf.mxu0 }
 0x205   : > { %2648 = vpow2.f32 %v1616_v29 }
 0x206   : > { %v1603_v34 = vsub.f32 0.0, %v1544_v31 }
 0x208   : > { %v1614_v35 = vmul.f32 1.442695, %v1603_v34 }
 0x209   : > { %v2647_v37 = vpop.eup %2646  ;;  %v1532_v38 = vpop.f32.mrf.mxu2 }
 0x20a   : > { %1636 = vst [vmem:[%s3139_s19 + $0x10] sm:$0xff] %v2647_v37  ;;  %2650 = vpow2.f32 %v1614_v35 }
 0x20b   : > { %v2649_v39 = vpop.eup %2648 }
 0x20c   : > { %v1625_v40 = vadd.f32 1.0, %v2649_v39 }
 0x20e   : > { %2652 = vrcp.f32 %v1625_v40 }
 0x210   : > { %v2651_v41 = vpop.eup %2650 }
 0x211   : > { %v1624_v42 = vadd.f32 1.0, %v2651_v41 }
 0x213   : > { %2654 = vrcp.f32 %v1624_v42 }
 0x214   : > { %v2653_v43 = vpop.eup %2652 }
 0x215   : > { %1639 = vst [vmem:[%s3139_s19 + $0x28] sm:$0xff] %v2653_v43 }
 0x219   : > { %v2655_v45 = vpop.eup %2654 }
 0x21a   : > { %1638 = vst [vmem:[%s3139_s19 + $0x20] sm:$0xff] %v2655_v45 }
 0x21b   : > { %v1595_v44 = vpop.f32.mrf.mxu3 }
 0x221   : > { %v1582_v47 = vpop.f32.mrf.mxu2 }
 0x222   : > { %v1583_v14 = vadd.f32 %v1582_v47, %v833_v46 }
 0x223   : > { %v1597_v48 = vpop.f32.mrf.mxu3 }
 0x224   : > { %v1596_v32 = vadd.f32 %v1595_v44, %v1583_v14 }
 0x226   : > { %v1605_v49 = vsub.f32 0.0, %v1596_v32 }
 0x228   : > { %v1618_v50 = vmul.f32 1.442695, %v1605_v49 }
 0x229   : > { %v1584_v51 = vpop.f32.mrf.mxu2 }
 0x22a   : > { %2656 = vpow2.f32 %v1618_v50 }
 0x230   : > { %v2657_v52 = vpop.eup %2656 }
 0x231   : > { %v1626_v53 = vadd.f32 1.0, %v2657_v52 }
 0x233   : > { %2658 = vrcp.f32 %v1626_v53 }
 0x239   : > { %v2659_v36 = vpop.eup %2658 }
 0x23a   : > { %1641 = vst.msk [vmem:[%s3139_s19 + $0x30] sm:$0xff] %vm1640_vm2, %v2659_v36 }
 0x23b   : > { %2867 = shalt.err (!%p2864_p9)
}
 0x23c   : > { %2553 = dma.vmem_to_hbm [thread:$0]  (%p3055_p13), %s1657_s11, 896, %s1659_s16, %s1643_s17  }
 0x23d PF: > { %s1670_s12 = sand.u32 1, %s2906_s24   ;;  %p3201_p10 = scmp.ge.s32.totalorder %s2918_s27, 2 }
 0x23e   : > { %s1671_s19 = scalar_lea.sflag [#allocation4], %s1670_s12 }
 0x23f   : > { %p2576_p11 = pnand %p3201_p10, %p3060_p4 }
 0x241   : > { %p2577_p0 = pneg %p2576_p11 }
 0x243   : > { %2901 = dma.done.wait (%p2577_p0), %s1671_s19, 896  }
 0x244   : > { %2903 = vsyncadd (%p2577_p0), %s1671_s19, 4294966400  ;;  %p23_p2 = scmp.ge.s32.totalorder %s3035_s22, 4   ;;  %s3202_s24 = smov %s2910_s25 }
 0x245   : > { %s3203_s25 = smov %s2914_s26  ;;  %s3204_s26 = smov %s3047_s29 }
 0x246   : > { %s3205_s27 = smov %s3035_s22  ;;  %25 = sbr.rel (!%p23_p2) target bundleno = 10 (0xa), region = 113 }
 0x24b   :  { %1677 = vsyncpa [#allocation3], 1 }
 0x24c   :  { %1679 = vsyncpa [#allocation3 + $0x1], 1 }
 0x24d   :  { %1680 = vsyncpa [#allocation6], 1 }
 0x24e   :  { %1681 = vsyncpa [#allocation9], 1 }
 0x24f   :  { %1682 = vsyncpa [#allocation12], 1 }
 0x250   :  { %1683 = vsyncpa [#allocation4], 1 }
 0x251   :  { %1685 = vsyncpa [#allocation4 + $0x1], 1 }

</bundles_post_ra>
